<compile_context>
chip_gen: v7x
topology: tpu7x:2x2x1
jax: 0.10.0
libtpu: 0.0.40
codegen_flags: <defaults>
</compile_context>

<pallas_src>
import jax
import jax.numpy as jnp
from jax.experimental import pallas as pl
from jax.experimental.pallas import tpu as pltpu


D_IN = 28 * 28          # 784
LAYER_DIMS = [(784, 512), (512, 256), (256, 128),
              (128, 256), (256, 512), (512, 784)]


def _leaky_relu_f32(v):
    # PyTorch nn.LeakyReLU default negative_slope = 0.01 (2 VPU ops: mul+max)
    return jnp.maximum(v, 0.01 * v)


def autoencoder_kernel(x_ref,
                       w1, b1, w2, b2, w34, b34, w5, b5, w6, b6,
                       out_ref):
    def dense(h_bf16, w_ref, b_ref):
        # bf16 x bf16 matmul on the MXU with f32 accumulation; bias add in f32.
        z = jnp.dot(h_bf16, w_ref[...], preferred_element_type=jnp.float32)
        return z + b_ref[...]

    def leaky_bf16(z_f32):
        # LeakyReLU in f32, carried forward as bf16 for the next MXU matmul.
        return _leaky_relu_f32(z_f32).astype(jnp.bfloat16)

    h = x_ref[...]                                  # (TM, 784) bf16

    # ---- encoder ----
    h = leaky_bf16(dense(h, w1, b1))                # 784 -> 512
    h = leaky_bf16(dense(h, w2, b2))                # 512 -> 256
    # ---- folded encoder L3 (no act) + decoder L1 (LeakyReLU) ----
    h = leaky_bf16(dense(h, w34, b34))              # 256 -> (128) -> 256
    # ---- decoder ----
    h = leaky_bf16(dense(h, w5, b5))                # 256 -> 512
    z = dense(h, w6, b6)                            # 512 -> 784
    # sigmoid = 1 / (1 + exp(-z)); divide on the EUP slot.
    out_ref[...] = pl.reciprocal(1.0 + jnp.exp(-z), approx=True)


def _round_up(n, m):
    return ((n + m - 1) // m) * m


def _choose_tm(B):
    """Batch-tile rows: big tiles amortize grid-step overhead and stream more
    LHS rows per stationary weight push; keep >= 2 grid steps for v7x."""
    if B >= 1024:
        return 512
    if B >= 16:
        return min(512, _round_up((B + 1) // 2, 8))   # >= 2 grid steps
    return _round_up(max(B, 1), 8)                    # single small tile


def prepare_params(params):
    """One-time parameter prep (hoisted out of the per-call path).

    params: list of 6 (w, b) pairs, w: (fan_in, fan_out) f32, b: (1, fan_out).
    Returns 5 (w_bf16, b_f32) pairs with the activation-free 256->128->256
    pair folded into one 256x256 layer.
    """
    (w1, b1), (w2, b2), (w3, b3), (w4, b4), (w5, b5), (w6, b6) = params
    w3f = jnp.asarray(w3, jnp.float32)
    w4f = jnp.asarray(w4, jnp.float32)
    w34 = w3f @ w4f
    b34 = jnp.asarray(b3, jnp.float32).reshape(1, -1) @ w4f \
        + jnp.asarray(b4, jnp.float32).reshape(1, -1)

    prepped = []
    for w, b in [(w1, b1), (w2, b2), (w34, b34), (w5, b5), (w6, b6)]:
        prepped.append((jnp.asarray(w, jnp.bfloat16),
                        jnp.asarray(b, jnp.float32).reshape(1, -1)))
    return prepped


def autoencoder_forward(x_nchw, prepped_params):
    """x_nchw: (B, 1, 28, 28) float32.  prepped_params: from prepare_params.
    Returns (B, 1, 28, 28) float32."""
    B = x_nchw.shape[0]
    x = x_nchw.reshape(B, D_IN).astype(jnp.bfloat16)   # bf16 input stream

    TM = _choose_tm(B)
    Bp = _round_up(B, TM)
    if Bp != B:                                        # only pad when needed
        x = jnp.zeros((Bp, D_IN), jnp.bfloat16).at[:B].set(x)

    # Activations tiled over the batch grid; weights/biases use a constant
    # block index -> resident in VMEM across grid steps.
    in_specs = [pl.BlockSpec((TM, D_IN), lambda i: (i, 0))]
    flat_params = []
    for w, b in prepped_params:
        flat_params += [w, b]
        in_specs.append(pl.BlockSpec(w.shape, lambda i: (0, 0)))
        in_specs.append(pl.BlockSpec(b.shape, lambda i: (0, 0)))
    out_spec = pl.BlockSpec((TM, D_IN), lambda i: (i, 0))

    decoded = pl.pallas_call(
        autoencoder_kernel,
        out_shape=jax.ShapeDtypeStruct((Bp, D_IN), jnp.float32),
        grid_spec=pltpu.PrefetchScalarGridSpec(
            num_scalar_prefetch=0,
            grid=(Bp // TM,),
            in_specs=in_specs,
            out_specs=out_spec,
        ),
        compiler_params=pltpu.CompilerParams(
            dimension_semantics=("parallel",),   # v7x: shard batch tiles on 2 TCs
            vmem_limit_bytes=32 << 20,
        ),
    )(x, *flat_params)

    if Bp != B:
        decoded = decoded[:B]
    return decoded.reshape(B, 1, 28, 28)


def init_params(key):
    """Deterministic init mirroring PyTorch nn.Linear default:
    U(-1/sqrt(fan_in), 1/sqrt(fan_in)) for both weight and bias."""
    params = []
    for (fan_in, fan_out) in LAYER_DIMS:
        key, kw, kb = jax.random.split(key, 3)
        bound = 1.0 / jnp.sqrt(float(fan_in))
        w = jax.random.uniform(kw, (fan_in, fan_out), jnp.float32, -bound, bound)
        b = jax.random.uniform(kb, (1, fan_out), jnp.float32, -bound, bound)
        params.append((w, b))
    return params


def reference_forward_f32(x_nchw, params):
    """Pure-JAX f32 reference matching the PyTorch module semantics."""
    B = x_nchw.shape[0]
    h = x_nchw.reshape(B, D_IN).astype(jnp.float32)
    acts = [_leaky_relu_f32, _leaky_relu_f32, lambda v: v,
            _leaky_relu_f32, _leaky_relu_f32, jax.nn.sigmoid]
    for (w, b), act in zip(params, acts):
        h = act(h @ w + b)
    return h.reshape(B, 1, 28, 28)


def reference_forward_bf16_folded(x_nchw, prepped_params):
    """Pure-JAX reference matching the kernel's recipe (bf16 weights/acts,
    f32 accumulate, folded 256x256 layer) for a tighter correctness check."""
    B = x_nchw.shape[0]
    h = x_nchw.reshape(B, D_IN).astype(jnp.bfloat16)
    n = len(prepped_params)
    for idx, (w, b) in enumerate(prepped_params):
        z = jnp.dot(h, w, preferred_element_type=jnp.float32) + b
        if idx < n - 1:
            h = _leaky_relu_f32(z).astype(jnp.bfloat16)
        else:
            out = 1.0 / (1.0 + jnp.exp(-z))
    return out.reshape(B, 1, 28, 28)


if __name__ == "__main__":
    key = jax.random.PRNGKey(0)
    key, kx = jax.random.split(key)

    B = 8
    x = jax.random.uniform(kx, (B, 1, 28, 28), jnp.float32)  # MNIST-like input
    params = init_params(key)

    prepped = prepare_params(params)          # one-time parameter prep
    fwd = jax.jit(autoencoder_forward)

    out = fwd(x, prepped)
    out = jax.block_until_ready(out)
    assert out.shape == (B, 1, 28, 28), out.shape
    assert bool(jnp.all(jnp.isfinite(out)))

    # Check vs. a reference using the same bf16/fold recipe (approx reciprocal
    # in the sigmoid adds a small extra tolerance).
    ref_bf16 = reference_forward_bf16_folded(x, prepped)
    err_bf16 = float(jnp.max(jnp.abs(out - ref_bf16)))
    assert err_bf16 < 1e-2, err_bf16

    # Loose sanity check vs. the full-f32 PyTorch-equivalent reference.
    ref_f32 = reference_forward_f32(x, params)
    err_f32 = float(jnp.max(jnp.abs(out - ref_f32)))
    assert err_f32 < 3e-2, err_f32

    print("KERNEL_OK")
</pallas_src>

<mosaic_0001>
module attributes {stable_mosaic.version = 11 : i64} {
  func.func @autoencoder_kernel(%arg0: i32, %arg1: memref<8x784xbf16, #tpu.memory_space<vmem>>, %arg2: memref<784x512xbf16, #tpu.memory_space<vmem>>, %arg3: memref<1x512xf32, #tpu.memory_space<vmem>>, %arg4: memref<512x256xbf16, #tpu.memory_space<vmem>>, %arg5: memref<1x256xf32, #tpu.memory_space<vmem>>, %arg6: memref<256x256xbf16, #tpu.memory_space<vmem>>, %arg7: memref<1x256xf32, #tpu.memory_space<vmem>>, %arg8: memref<256x512xbf16, #tpu.memory_space<vmem>>, %arg9: memref<1x512xf32, #tpu.memory_space<vmem>>, %arg10: memref<512x784xbf16, #tpu.memory_space<vmem>>, %arg11: memref<1x784xf32, #tpu.memory_space<vmem>>, %arg12: memref<8x784xf32, #tpu.memory_space<vmem>>) attributes {dimension_semantics = [#tpu.dimension_semantics<parallel>], iteration_bounds = array<i64: 1>, scalar_prefetch = 0 : i64, scratch_operands = 0 : i64, tpu.core_type = #tpu.core_type<tc>, window_params = [{transform_indices = @transform_0, window_bounds = array<i64: 8, 784>}, {pipeline_mode = #tpu.pipeline_mode<synchronous>, transform_indices = @transform_1, window_bounds = array<i64: 784, 512>}, {pipeline_mode = #tpu.pipeline_mode<synchronous>, transform_indices = @transform_2, window_bounds = array<i64: 1, 512>}, {pipeline_mode = #tpu.pipeline_mode<synchronous>, transform_indices = @transform_3, window_bounds = array<i64: 512, 256>}, {pipeline_mode = #tpu.pipeline_mode<synchronous>, transform_indices = @transform_4, window_bounds = array<i64: 1, 256>}, {pipeline_mode = #tpu.pipeline_mode<synchronous>, transform_indices = @transform_5, window_bounds = array<i64: 256, 256>}, {pipeline_mode = #tpu.pipeline_mode<synchronous>, transform_indices = @transform_6, window_bounds = array<i64: 1, 256>}, {pipeline_mode = #tpu.pipeline_mode<synchronous>, transform_indices = @transform_7, window_bounds = array<i64: 256, 512>}, {pipeline_mode = #tpu.pipeline_mode<synchronous>, transform_indices = @transform_8, window_bounds = array<i64: 1, 512>}, {pipeline_mode = #tpu.pipeline_mode<synchronous>, transform_indices = @transform_9, window_bounds = array<i64: 512, 784>}, {pipeline_mode = #tpu.pipeline_mode<synchronous>, transform_indices = @transform_10, window_bounds = array<i64: 1, 784>}, {transform_indices = @transform_11, window_bounds = array<i64: 8, 784>}]} {
    %c0 = arith.constant 0 : index
    %c0_0 = arith.constant 0 : index
    %0 = vector.load %arg1[%c0, %c0_0] : memref<8x784xbf16, #tpu.memory_space<vmem>>, vector<8x784xbf16>
    %c0_1 = arith.constant 0 : index
    %c0_2 = arith.constant 0 : index
    %1 = vector.load %arg2[%c0_1, %c0_2] : memref<784x512xbf16, #tpu.memory_space<vmem>>, vector<784x512xbf16>
    %cst = arith.constant dense<0.000000e+00> : vector<8x512xf32>
    %2 = tpu.matmul %0, %1, %cst {dimension_numbers = #tpu.dot_dimension_numbers<[1], [0], [0], [1], [0, 0, 1, 1], [], []>} : vector<8x784xbf16>, vector<784x512xbf16>, vector<8x512xf32> -> vector<8x512xf32>
    %c0_3 = arith.constant 0 : index
    %c0_4 = arith.constant 0 : index
    %3 = vector.load %arg3[%c0_3, %c0_4] : memref<1x512xf32, #tpu.memory_space<vmem>>, vector<1x512xf32>
    %4 = vector.broadcast %3 : vector<1x512xf32> to vector<8x512xf32>
    %5 = arith.addf %2, %4 : vector<8x512xf32>
    %cst_5 = arith.constant 0.00999999977 : f32
    %6 = vector.broadcast %cst_5 : f32 to vector<8x512xf32>
    %7 = arith.mulf %6, %5 : vector<8x512xf32>
    %8 = arith.maximumf %5, %7 : vector<8x512xf32>
    %9 = arith.truncf %8 : vector<8x512xf32> to vector<8x512xbf16>
    %c0_6 = arith.constant 0 : index
    %c0_7 = arith.constant 0 : index
    %10 = vector.load %arg4[%c0_6, %c0_7] : memref<512x256xbf16, #tpu.memory_space<vmem>>, vector<512x256xbf16>
    %cst_8 = arith.constant dense<0.000000e+00> : vector<8x256xf32>
    %11 = tpu.matmul %9, %10, %cst_8 {dimension_numbers = #tpu.dot_dimension_numbers<[1], [0], [0], [1], [0, 0, 1, 1], [], []>} : vector<8x512xbf16>, vector<512x256xbf16>, vector<8x256xf32> -> vector<8x256xf32>
    %c0_9 = arith.constant 0 : index
    %c0_10 = arith.constant 0 : index
    %12 = vector.load %arg5[%c0_9, %c0_10] : memref<1x256xf32, #tpu.memory_space<vmem>>, vector<1x256xf32>
    %13 = vector.broadcast %12 : vector<1x256xf32> to vector<8x256xf32>
    %14 = arith.addf %11, %13 : vector<8x256xf32>
    %cst_11 = arith.constant 0.00999999977 : f32
    %15 = vector.broadcast %cst_11 : f32 to vector<8x256xf32>
    %16 = arith.mulf %15, %14 : vector<8x256xf32>
    %17 = arith.maximumf %14, %16 : vector<8x256xf32>
    %18 = arith.truncf %17 : vector<8x256xf32> to vector<8x256xbf16>
    %c0_12 = arith.constant 0 : index
    %c0_13 = arith.constant 0 : index
    %19 = vector.load %arg6[%c0_12, %c0_13] : memref<256x256xbf16, #tpu.memory_space<vmem>>, vector<256x256xbf16>
    %cst_14 = arith.constant dense<0.000000e+00> : vector<8x256xf32>
    %20 = tpu.matmul %18, %19, %cst_14 {dimension_numbers = #tpu.dot_dimension_numbers<[1], [0], [0], [1], [0, 0, 1, 1], [], []>} : vector<8x256xbf16>, vector<256x256xbf16>, vector<8x256xf32> -> vector<8x256xf32>
    %c0_15 = arith.constant 0 : index
    %c0_16 = arith.constant 0 : index
    %21 = vector.load %arg7[%c0_15, %c0_16] : memref<1x256xf32, #tpu.memory_space<vmem>>, vector<1x256xf32>
    %22 = vector.broadcast %21 : vector<1x256xf32> to vector<8x256xf32>
    %23 = arith.addf %20, %22 : vector<8x256xf32>
    %cst_17 = arith.constant 0.00999999977 : f32
    %24 = vector.broadcast %cst_17 : f32 to vector<8x256xf32>
    %25 = arith.mulf %24, %23 : vector<8x256xf32>
    %26 = arith.maximumf %23, %25 : vector<8x256xf32>
    %27 = arith.truncf %26 : vector<8x256xf32> to vector<8x256xbf16>
    %c0_18 = arith.constant 0 : index
    %c0_19 = arith.constant 0 : index
    %28 = vector.load %arg8[%c0_18, %c0_19] : memref<256x512xbf16, #tpu.memory_space<vmem>>, vector<256x512xbf16>
    %cst_20 = arith.constant dense<0.000000e+00> : vector<8x512xf32>
    %29 = tpu.matmul %27, %28, %cst_20 {dimension_numbers = #tpu.dot_dimension_numbers<[1], [0], [0], [1], [0, 0, 1, 1], [], []>} : vector<8x256xbf16>, vector<256x512xbf16>, vector<8x512xf32> -> vector<8x512xf32>
    %c0_21 = arith.constant 0 : index
    %c0_22 = arith.constant 0 : index
    %30 = vector.load %arg9[%c0_21, %c0_22] : memref<1x512xf32, #tpu.memory_space<vmem>>, vector<1x512xf32>
    %31 = vector.broadcast %30 : vector<1x512xf32> to vector<8x512xf32>
    %32 = arith.addf %29, %31 : vector<8x512xf32>
    %cst_23 = arith.constant 0.00999999977 : f32
    %33 = vector.broadcast %cst_23 : f32 to vector<8x512xf32>
    %34 = arith.mulf %33, %32 : vector<8x512xf32>
    %35 = arith.maximumf %32, %34 : vector<8x512xf32>
    %36 = arith.truncf %35 : vector<8x512xf32> to vector<8x512xbf16>
    %c0_24 = arith.constant 0 : index
    %c0_25 = arith.constant 0 : index
    %37 = vector.load %arg10[%c0_24, %c0_25] : memref<512x784xbf16, #tpu.memory_space<vmem>>, vector<512x784xbf16>
    %cst_26 = arith.constant dense<0.000000e+00> : vector<8x784xf32>
    %38 = tpu.matmul %36, %37, %cst_26 {dimension_numbers = #tpu.dot_dimension_numbers<[1], [0], [0], [1], [0, 0, 1, 1], [], []>} : vector<8x512xbf16>, vector<512x784xbf16>, vector<8x784xf32> -> vector<8x784xf32>
    %c0_27 = arith.constant 0 : index
    %c0_28 = arith.constant 0 : index
    %39 = vector.load %arg11[%c0_27, %c0_28] : memref<1x784xf32, #tpu.memory_space<vmem>>, vector<1x784xf32>
    %40 = vector.broadcast %39 : vector<1x784xf32> to vector<8x784xf32>
    %41 = arith.addf %38, %40 : vector<8x784xf32>
    %cst_29 = arith.constant 0.000000e+00 : f32
    %42 = vector.broadcast %cst_29 : f32 to vector<8x784xf32>
    %43 = arith.subf %42, %41 : vector<8x784xf32>
    %44 = math.exp %43 : vector<8x784xf32>
    %cst_30 = arith.constant 1.000000e+00 : f32
    %45 = vector.broadcast %cst_30 : f32 to vector<8x784xf32>
    %46 = arith.addf %45, %44 : vector<8x784xf32>
    %47 = tpu.reciprocal %46 {approx = true} : vector<8x784xf32> -> vector<8x784xf32>
    %c0_31 = arith.constant 0 : index
    %c0_32 = arith.constant 0 : index
    %48 = vector.load %arg12[%c0_31, %c0_32] : memref<8x784xf32, #tpu.memory_space<vmem>>, vector<8x784xf32>
    tpu.vector_store %arg12[%c0_31, %c0_32], %47 {strides = array<i32>} : memref<8x784xf32, #tpu.memory_space<vmem>>, vector<8x784xf32>,
    return
  }
  func.func @transform_0(%arg0: i32) -> (i32, i32) {
    %c0_i32 = arith.constant 0 : i32
    %c0_i32_0 = arith.constant 0 : i32
    return %arg0, %c0_i32 : i32, i32
  }
  func.func @transform_1(%arg0: i32) -> (i32, i32) {
    %c0_i32 = arith.constant 0 : i32
    %c0_i32_0 = arith.constant 0 : i32
    %c0_i32_1 = arith.constant 0 : i32
    return %c0_i32, %c0_i32_0 : i32, i32
  }
  func.func @transform_2(%arg0: i32) -> (i32, i32) {
    %c0_i32 = arith.constant 0 : i32
    %c0_i32_0 = arith.constant 0 : i32
    %c0_i32_1 = arith.constant 0 : i32
    return %c0_i32, %c0_i32_0 : i32, i32
  }
  func.func @transform_3(%arg0: i32) -> (i32, i32) {
    %c0_i32 = arith.constant 0 : i32
    %c0_i32_0 = arith.constant 0 : i32
    %c0_i32_1 = arith.constant 0 : i32
    return %c0_i32, %c0_i32_0 : i32, i32
  }
  func.func @transform_4(%arg0: i32) -> (i32, i32) {
    %c0_i32 = arith.constant 0 : i32
    %c0_i32_0 = arith.constant 0 : i32
    %c0_i32_1 = arith.constant 0 : i32
    return %c0_i32, %c0_i32_0 : i32, i32
  }
  func.func @transform_5(%arg0: i32) -> (i32, i32) {
    %c0_i32 = arith.constant 0 : i32
    %c0_i32_0 = arith.constant 0 : i32
    %c0_i32_1 = arith.constant 0 : i32
    return %c0_i32, %c0_i32_0 : i32, i32
  }
  func.func @transform_6(%arg0: i32) -> (i32, i32) {
    %c0_i32 = arith.constant 0 : i32
    %c0_i32_0 = arith.constant 0 : i32
    %c0_i32_1 = arith.constant 0 : i32
    return %c0_i32, %c0_i32_0 : i32, i32
  }
  func.func @transform_7(%arg0: i32) -> (i32, i32) {
    %c0_i32 = arith.constant 0 : i32
    %c0_i32_0 = arith.constant 0 : i32
    %c0_i32_1 = arith.constant 0 : i32
    return %c0_i32, %c0_i32_0 : i32, i32
  }
  func.func @transform_8(%arg0: i32) -> (i32, i32) {
    %c0_i32 = arith.constant 0 : i32
    %c0_i32_0 = arith.constant 0 : i32
    %c0_i32_1 = arith.constant 0 : i32
    return %c0_i32, %c0_i32_0 : i32, i32
  }
  func.func @transform_9(%arg0: i32) -> (i32, i32) {
    %c0_i32 = arith.constant 0 : i32
    %c0_i32_0 = arith.constant 0 : i32
    %c0_i32_1 = arith.constant 0 : i32
    return %c0_i32, %c0_i32_0 : i32, i32
  }
  func.func @transform_10(%arg0: i32) -> (i32, i32) {
    %c0_i32 = arith.constant 0 : i32
    %c0_i32_0 = arith.constant 0 : i32
    %c0_i32_1 = arith.constant 0 : i32
    return %c0_i32, %c0_i32_0 : i32, i32
  }
  func.func @transform_11(%arg0: i32) -> (i32, i32) {
    %c0_i32 = arith.constant 0 : i32
    %c0_i32_0 = arith.constant 0 : i32
    return %arg0, %c0_i32 : i32, i32
  }
}

</mosaic_0001>

<bundles_post_ra>
// kernel: autoencoder_forward.1
= control target key start
LH: loop header
LB: loop body
LE: loop exit
PB: predicated region body
PF: predicated region fallthrough
CT: control target
= control target key end

     0   :  { %vm1265_vm0 = vcmask 130048   ;;  %s8184_s1 = inlined_call_operand.vmem [shape: bf16[784,512], index: 1, kind: input, shape index: {}]   ;;  %s8185_s0 = inlined_call_operand.vmem [shape: bf16[8,784], index: 0, kind: input, shape index: {}]   ;;  %s8186_s3 = inlined_call_operand.vmem [shape: bf16[512,256], index: 3, kind: input, shape index: {}]   ;;  %s8187_s5 = inlined_call_operand.vmem [shape: bf16[256,256], index: 5, kind: input, shape index: {}]   ;;  %s8188_s2 = inlined_call_operand.vmem [shape: f32[1,512], index: 2, kind: input, shape index: {}]   ;;  %s8189_s7 = inlined_call_operand.vmem [shape: bf16[256,512], index: 7, kind: input, shape index: {}]   ;;  %s8190_s4 = inlined_call_operand.vmem [shape: f32[1,256], index: 4, kind: input, shape index: {}]   ;;  %s8191_s9 = inlined_call_operand.vmem [shape: bf16[512,784], index: 9, kind: input, shape index: {}]   ;;  %s8192_s6 = inlined_call_operand.vmem [shape: f32[1,256], index: 6, kind: input, shape index: {}]   ;;  %s8193_s8 = inlined_call_operand.vmem [shape: f32[1,512], index: 8, kind: input, shape index: {}]   ;;  %s8194_s10 = inlined_call_operand.vmem [shape: f32[1,784], index: 10, kind: input, shape index: {}]   ;;  %s8195_s11 = inlined_call_operand.vmem [shape: f32[8,784], index: 11, kind: output, shape index: {}]  }
   0x1   :  { %v5347_v0 = vld [vmem:[%s8184_s1 + $0x4] ss:$16 sps:$4 sm:$0xff]   ;;  %v5349_v1 = vld [vmem:[%s8184_s1 + $0xc] ss:$16 sps:$4 sm:$0xff]   ;;  %v5351_v2 = vld [vmem:[%s8184_s1] ss:$16 sps:$4 sm:$0xff]  }
   0x2   :  { %1269 = vmatprep.subr.bf16.mxu0 %v5347_v0  ;;  %v5352_v3 = vld [vmem:[%s8184_s1 + $0x8] ss:$16 sps:$4 sm:$0xff]   ;;  %1433 = vmatprep.subr.bf16.mxu1 %v5349_v1  ;;  %v5353_v4 = vld [vmem:[%s8184_s1 + $0x24] ss:$16 sps:$4 sm:$0xff]   ;;  %v5355_v5 = vld [vmem:[%s8184_s1 + $0x2c] ss:$16 sps:$4 sm:$0xff]  }
   0x3   :  { %1270 = vmatpush1.bf16.msra.mxu0 %v5351_v2  ;;  %1434 = vmatpush1.bf16.msra.mxu1 %v5352_v3  ;;  %v5357_v6 = vld [vmem:[%s8184_s1 + $0x20] ss:$16 sps:$4 sm:$0xff]   ;;  %v5358_v7 = vld [vmem:[%s8184_s1 + $0x28] ss:$16 sps:$4 sm:$0xff]   ;;  %v5359_v8 = vld [vmem:[%s8184_s1 + $0x44] ss:$16 sps:$4 sm:$0xff]  }
   0x4   :  { %1271 = vmatprep.subr.bf16.mxu0 %v5353_v4  ;;  %1435 = vmatprep.subr.bf16.mxu1 %v5355_v5  ;;  %v5361_v9 = vld [vmem:[%s8184_s1 + $0x4c] ss:$16 sps:$4 sm:$0xff]   ;;  %v5363_v10 = vld [vmem:[%s8184_s1 + $0x40] ss:$16 sps:$4 sm:$0xff]   ;;  %v5364_v11 = vld [vmem:[%s8184_s1 + $0x48] ss:$16 sps:$4 sm:$0xff]  }
   0x5   :  { %v5365_v12 = vld [vmem:[%s8184_s1 + $0x64] ss:$16 sps:$4 sm:$0xff]   ;;  %v5367_v13 = vld [vmem:[%s8184_s1 + $0x6c] ss:$16 sps:$4 sm:$0xff]   ;;  %v5369_v14 = vld [vmem:[%s8184_s1 + $0x60] ss:$16 sps:$4 sm:$0xff]  }
   0x6   :  { %v5370_v15 = vld [vmem:[%s8184_s1 + $0x68] ss:$16 sps:$4 sm:$0xff]   ;;  %v5371_v16 = vld [vmem:[%s8184_s1 + $0x84] ss:$16 sps:$4 sm:$0xff]   ;;  %v5373_v17 = vld [vmem:[%s8184_s1 + $0x8c] ss:$16 sps:$4 sm:$0xff]  }
   0x7   :  { %1272 = vmatpush1.bf16.msra.mxu0 %v5357_v6  ;;  %1436 = vmatpush1.bf16.msra.mxu1 %v5358_v7  ;;  %v5375_v18 = vld [vmem:[%s8184_s1 + $0x80] ss:$16 sps:$4 sm:$0xff]   ;;  %v5376_v19 = vld [vmem:[%s8184_s1 + $0x88] ss:$16 sps:$4 sm:$0xff]   ;;  %v5377_v20 = vld [vmem:[%s8184_s1 + $0xa4] ss:$16 sps:$4 sm:$0xff]  }
   0x8   :  { %1273 = vmatprep.subr.bf16.mxu0 %v5359_v8  ;;  %1437 = vmatprep.subr.bf16.mxu1 %v5361_v9  ;;  %v5379_v21 = vld [vmem:[%s8184_s1 + $0xac] ss:$16 sps:$4 sm:$0xff]   ;;  %v5381_v22 = vld [vmem:[%s8184_s1 + $0xa0] ss:$16 sps:$4 sm:$0xff]   ;;  %v5382_v23 = vld [vmem:[%s8184_s1 + $0xa8] ss:$16 sps:$4 sm:$0xff]  }
   0x9   :  { %v5383_v24 = vld [vmem:[%s8184_s1 + $0xc4] ss:$16 sps:$4 sm:$0xff]   ;;  %v5385_v25 = vld [vmem:[%s8184_s1 + $0xcc] ss:$16 sps:$4 sm:$0xff]   ;;  %v5387_v26 = vld [vmem:[%s8184_s1 + $0xc0] ss:$16 sps:$4 sm:$0xff]  }
   0xa   :  { %v5388_v27 = vld [vmem:[%s8184_s1 + $0xc8] ss:$16 sps:$4 sm:$0xff]   ;;  %v5389_v28 = vld [vmem:[%s8184_s1 + $0xe4] ss:$16 sps:$4 sm:$0xff]   ;;  %v5391_v29 = vld [vmem:[%s8184_s1 + $0xec] ss:$16 sps:$4 sm:$0xff]  }
   0xb   :  { %1274 = vmatpush1.bf16.msra.mxu0 %v5363_v10  ;;  %1438 = vmatpush1.bf16.msra.mxu1 %v5364_v11  ;;  %v5393_v30 = vld [vmem:[%s8184_s1 + $0xe0] ss:$16 sps:$4 sm:$0xff]   ;;  %v5394_v31 = vld [vmem:[%s8184_s1 + $0xe8] ss:$16 sps:$4 sm:$0xff]   ;;  %v5395_v32 = vld [vmem:[%s8184_s1 + $0x104] ss:$16 sps:$4 sm:$0xff]  }
   0xc   :  { %1275 = vmatprep.subr.bf16.mxu0 %v5365_v12  ;;  %1439 = vmatprep.subr.bf16.mxu1 %v5367_v13  ;;  %v5397_v33 = vld [vmem:[%s8184_s1 + $0x10c] ss:$16 sps:$4 sm:$0xff]   ;;  %v5399_v34 = vld [vmem:[%s8184_s1 + $0x100] ss:$16 sps:$4 sm:$0xff]   ;;  %v5400_v35 = vld [vmem:[%s8184_s1 + $0x108] ss:$16 sps:$4 sm:$0xff]  }
   0xd   :  { %v5401_v36 = vld [vmem:[%s8184_s1 + $0x124] ss:$16 sps:$4 sm:$0xff]   ;;  %v5403_v37 = vld [vmem:[%s8184_s1 + $0x12c] ss:$16 sps:$4 sm:$0xff]   ;;  %v5405_v38 = vld [vmem:[%s8184_s1 + $0x120] ss:$16 sps:$4 sm:$0xff]  }
   0xe   :  { %v5406_v39 = vld [vmem:[%s8184_s1 + $0x128] ss:$16 sps:$4 sm:$0xff]   ;;  %v5407_v40 = vld [vmem:[%s8184_s1 + $0x144] ss:$16 sps:$4 sm:$0xff]   ;;  %v5409_v41 = vld [vmem:[%s8184_s1 + $0x14c] ss:$16 sps:$4 sm:$0xff]  }
   0xf   :  { %1276 = vmatpush1.bf16.msra.mxu0 %v5369_v14  ;;  %1440 = vmatpush1.bf16.msra.mxu1 %v5370_v15  ;;  %v5411_v42 = vld [vmem:[%s8184_s1 + $0x140] ss:$16 sps:$4 sm:$0xff]   ;;  %v5412_v43 = vld [vmem:[%s8184_s1 + $0x148] ss:$16 sps:$4 sm:$0xff]   ;;  %v5413_v44 = vld [vmem:[%s8184_s1 + $0x164] ss:$16 sps:$4 sm:$0xff]  }
  0x10   :  { %1277 = vmatprep.subr.bf16.mxu0 %v5371_v16  ;;  %1441 = vmatprep.subr.bf16.mxu1 %v5373_v17  ;;  %v5415_v45 = vld [vmem:[%s8184_s1 + $0x16c] ss:$16 sps:$4 sm:$0xff]   ;;  %v39_v46 = vld [vmem:[%s8185_s0] sm:$0xff]  ;;  %v5418_v49 = vld [vmem:[%s8184_s1 + $0x168] ss:$16 sps:$4 sm:$0xff]  }
  0x11   :  { %v5417_v47 = vld [vmem:[%s8184_s1 + $0x160] ss:$16 sps:$4 sm:$0xff]   ;;  %v4662_v48 = vcombine.high %v39_v46, %v39_v46  ;;  %v5419_v50 = vld [vmem:[%s8184_s1 + $0x184] ss:$16 sps:$4 sm:$0xff]   ;;  %v5421_v51 = vld [vmem:[%s8184_s1 + $0x18c] ss:$16 sps:$4 sm:$0xff]   ;;  %v4661_v4 = vcombine.low %v39_v46, %v39_v46 }
  0x12   :  { %v5423_v52 = vld [vmem:[%s8184_s1 + $0x180] ss:$16 sps:$4 sm:$0xff]   ;;  %v5424_v53 = vld [vmem:[%s8184_s1 + $0x188] ss:$16 sps:$4 sm:$0xff]   ;;  %v5425_v54 = vld [vmem:[%s8184_s1 + $0x1a4] ss:$16 sps:$4 sm:$0xff]  }
  0x13   :  { %1278 = vmatpush1.bf16.msra.mxu0 %v5375_v18  ;;  %1442 = vmatpush1.bf16.msra.mxu1 %v5376_v19  ;;  %v5427_v55 = vld [vmem:[%s8184_s1 + $0x1ac] ss:$16 sps:$4 sm:$0xff]   ;;  %v5429_v56 = vld [vmem:[%s8184_s1 + $0x1a0] ss:$16 sps:$4 sm:$0xff]   ;;  %v5430_v57 = vld [vmem:[%s8184_s1 + $0x1a8] ss:$16 sps:$4 sm:$0xff]  }
  0x14   :  { %1279 = vmatprep.subr.bf16.mxu0 %v5377_v20  ;;  %1443 = vmatprep.subr.bf16.mxu1 %v5379_v21  ;;  %v5431_v58 = vld [vmem:[%s8184_s1 + $0x1c4] ss:$16 sps:$4 sm:$0xff]   ;;  %v5433_v59 = vld [vmem:[%s8184_s1 + $0x1cc] ss:$16 sps:$4 sm:$0xff]   ;;  %v5435_v60 = vld [vmem:[%s8184_s1 + $0x1c0] ss:$16 sps:$4 sm:$0xff]  }
  0x15   :  { %1301 = vmatprep.mubr.bf16.mxu0 %v4662_v48  ;;  %1465 = vmatprep.mubr.bf16.mxu1 %v4662_v48  ;;  %v5436_v61 = vld [vmem:[%s8184_s1 + $0x1c8] ss:$16 sps:$4 sm:$0xff]   ;;  %v5437_v62 = vld [vmem:[%s8184_s1 + $0x1e4] ss:$16 sps:$4 sm:$0xff]   ;;  %v5439_v63 = vld [vmem:[%s8184_s1 + $0x1ec] ss:$16 sps:$4 sm:$0xff]  }
  0x16   :  { %v5441_v0 = vld [vmem:[%s8184_s1 + $0x1e0] ss:$16 sps:$4 sm:$0xff]   ;;  %v5442_v1 = vld [vmem:[%s8184_s1 + $0x1e8] ss:$16 sps:$4 sm:$0xff]   ;;  %v5448_v2 = vld [vmem:[%s8184_s1 + $0x204] ss:$16 sps:$4 sm:$0xff]  }
  0x17   :  { %1280 = vmatpush1.bf16.msra.mxu0 %v5381_v22  ;;  %1444 = vmatpush1.bf16.msra.mxu1 %v5382_v23  ;;  %v5451_v3 = vld [vmem:[%s8184_s1 + $0x20c] ss:$16 sps:$4 sm:$0xff]   ;;  %v5446_v5 = vld [vmem:[%s8184_s1 + $0x200] ss:$16 sps:$4 sm:$0xff]   ;;  %v5449_v6 = vld [vmem:[%s8184_s1 + $0x208] ss:$16 sps:$4 sm:$0xff]  }
  0x18   :  { %1281 = vmatprep.subr.bf16.mxu0 %v5383_v24  ;;  %1445 = vmatprep.subr.bf16.mxu1 %v5385_v25  ;;  %v5454_v7 = vld [vmem:[%s8184_s1 + $0x224] ss:$16 sps:$4 sm:$0xff]   ;;  %v5457_v8 = vld [vmem:[%s8184_s1 + $0x22c] ss:$16 sps:$4 sm:$0xff]   ;;  %v5452_v9 = vld [vmem:[%s8184_s1 + $0x220] ss:$16 sps:$4 sm:$0xff]  }
  0x19   :  { %v5455_v10 = vld [vmem:[%s8184_s1 + $0x228] ss:$16 sps:$4 sm:$0xff]   ;;  %v5460_v11 = vld [vmem:[%s8184_s1 + $0x244] ss:$16 sps:$4 sm:$0xff]   ;;  %v5463_v12 = vld [vmem:[%s8184_s1 + $0x24c] ss:$16 sps:$4 sm:$0xff]  }
  0x1a   :  { %v5458_v13 = vld [vmem:[%s8184_s1 + $0x240] ss:$16 sps:$4 sm:$0xff]   ;;  %v5461_v14 = vld [vmem:[%s8184_s1 + $0x248] ss:$16 sps:$4 sm:$0xff]   ;;  %v5466_v15 = vld [vmem:[%s8184_s1 + $0x264] ss:$16 sps:$4 sm:$0xff]  }
  0x1b   :  { %1282 = vmatpush1.bf16.msra.mxu0 %v5387_v26  ;;  %1446 = vmatpush1.bf16.msra.mxu1 %v5388_v27  ;;  %v5469_v16 = vld [vmem:[%s8184_s1 + $0x26c] ss:$16 sps:$4 sm:$0xff]   ;;  %v5464_v17 = vld [vmem:[%s8184_s1 + $0x260] ss:$16 sps:$4 sm:$0xff]   ;;  %v5467_v18 = vld [vmem:[%s8184_s1 + $0x268] ss:$16 sps:$4 sm:$0xff]  }
  0x1c   :  { %1283 = vmatprep.subr.bf16.mxu0 %v5389_v28  ;;  %1447 = vmatprep.subr.bf16.mxu1 %v5391_v29  ;;  %v5472_v19 = vld [vmem:[%s8184_s1 + $0x284] ss:$16 sps:$4 sm:$0xff]   ;;  %v5475_v20 = vld [vmem:[%s8184_s1 + $0x28c] ss:$16 sps:$4 sm:$0xff]   ;;  %v5470_v21 = vld [vmem:[%s8184_s1 + $0x280] ss:$16 sps:$4 sm:$0xff]  }
  0x1d   :  { %v5473_v22 = vld [vmem:[%s8184_s1 + $0x288] ss:$16 sps:$4 sm:$0xff]   ;;  %v5478_v23 = vld [vmem:[%s8184_s1 + $0x2a4] ss:$16 sps:$4 sm:$0xff]   ;;  %v5481_v24 = vld [vmem:[%s8184_s1 + $0x2ac] ss:$16 sps:$4 sm:$0xff]  }
  0x1e   :  { %v5476_v25 = vld [vmem:[%s8184_s1 + $0x2a0] ss:$16 sps:$4 sm:$0xff]   ;;  %v5479_v26 = vld [vmem:[%s8184_s1 + $0x2a8] ss:$16 sps:$4 sm:$0xff]   ;;  %v5484_v27 = vld [vmem:[%s8184_s1 + $0x2c4] ss:$16 sps:$4 sm:$0xff]  }
  0x1f   :  { %1284 = vmatpush1.bf16.msra.mxu0 %v5393_v30  ;;  %1448 = vmatpush1.bf16.msra.mxu1 %v5394_v31  ;;  %v5487_v28 = vld [vmem:[%s8184_s1 + $0x2cc] ss:$16 sps:$4 sm:$0xff]   ;;  %v5482_v30 = vld [vmem:[%s8184_s1 + $0x2c0] ss:$16 sps:$4 sm:$0xff]   ;;  %v5485_v31 = vld [vmem:[%s8184_s1 + $0x2c8] ss:$16 sps:$4 sm:$0xff]  }
  0x20   :  { %1285 = vmatprep.subr.bf16.mxu0 %v5395_v32  ;;  %1449 = vmatprep.subr.bf16.mxu1 %v5397_v33  ;;  %v6573_v29 = vld [vmem:[%s8185_s0 + $0x8] sm:$0xff]  ;;  %v5490_v33 = vld [vmem:[%s8184_s1 + $0x2e4] ss:$16 sps:$4 sm:$0xff]  }
  0x21   :  { %v4664_v32 = vcombine.high %v6573_v29, %v6573_v29  ;;  %v5511_v46 = vld [vmem:[%s8184_s1 + $0x34c] ss:$16 sps:$4 sm:$0xff]   ;;  %v5509_v48 = vld [vmem:[%s8184_s1 + $0x348] ss:$16 sps:$4 sm:$0xff]  }
  0x23   :  { %1286 = vmatpush1.bf16.msra.mxu0 %v5399_v34  ;;  %1450 = vmatpush1.bf16.msra.mxu1 %v5400_v35  ;;  %v5493_v34 = vld [vmem:[%s8184_s1 + $0x2ec] ss:$16 sps:$4 sm:$0xff]   ;;  %v5488_v35 = vld [vmem:[%s8184_s1 + $0x2e0] ss:$16 sps:$4 sm:$0xff]  }
  0x24   :  { %1287 = vmatprep.subr.bf16.mxu0 %v5401_v36  ;;  %1451 = vmatprep.subr.bf16.mxu1 %v5403_v37  ;;  %v5491_v36 = vld [vmem:[%s8184_s1 + $0x2e8] ss:$16 sps:$4 sm:$0xff]   ;;  %v5496_v37 = vld [vmem:[%s8184_s1 + $0x304] ss:$16 sps:$4 sm:$0xff]  }
  0x27   :  { %1288 = vmatpush1.bf16.msra.mxu0 %v5405_v38  ;;  %1452 = vmatpush1.bf16.msra.mxu1 %v5406_v39  ;;  %v5499_v38 = vld [vmem:[%s8184_s1 + $0x30c] ss:$16 sps:$4 sm:$0xff]   ;;  %v5494_v39 = vld [vmem:[%s8184_s1 + $0x300] ss:$16 sps:$4 sm:$0xff]  }
  0x28   :  { %1289 = vmatprep.subr.bf16.mxu0 %v5407_v40  ;;  %1453 = vmatprep.subr.bf16.mxu1 %v5409_v41  ;;  %v5497_v40 = vld [vmem:[%s8184_s1 + $0x308] ss:$16 sps:$4 sm:$0xff]   ;;  %v5502_v41 = vld [vmem:[%s8184_s1 + $0x324] ss:$16 sps:$4 sm:$0xff]  }
  0x2b   :  { %1290 = vmatpush1.bf16.msra.mxu0 %v5411_v42  ;;  %1454 = vmatpush1.bf16.msra.mxu1 %v5412_v43  ;;  %v5505_v42 = vld [vmem:[%s8184_s1 + $0x32c] ss:$16 sps:$4 sm:$0xff]   ;;  %v5500_v43 = vld [vmem:[%s8184_s1 + $0x320] ss:$16 sps:$4 sm:$0xff]  }
  0x2c   :  { %1291 = vmatprep.subr.bf16.mxu0 %v5413_v44  ;;  %1455 = vmatprep.subr.bf16.mxu1 %v5415_v45  ;;  %v5503_v44 = vld [vmem:[%s8184_s1 + $0x328] ss:$16 sps:$4 sm:$0xff]   ;;  %v5508_v45 = vld [vmem:[%s8184_s1 + $0x344] ss:$16 sps:$4 sm:$0xff]  }
  0x2f   :  { %1292 = vmatpush1.bf16.msra.mxu0 %v5417_v47  ;;  %1456 = vmatpush1.bf16.msra.mxu1 %v5418_v49  ;;  %v5506_v47 = vld [vmem:[%s8184_s1 + $0x340] ss:$16 sps:$4 sm:$0xff]   ;;  %v5514_v49 = vld [vmem:[%s8184_s1 + $0x364] ss:$16 sps:$4 sm:$0xff]  }
  0x30   :  { %1293 = vmatprep.subr.bf16.mxu0 %v5419_v50  ;;  %1457 = vmatprep.subr.bf16.mxu1 %v5421_v51  ;;  %v5517_v50 = vld [vmem:[%s8184_s1 + $0x36c] ss:$16 sps:$4 sm:$0xff]   ;;  %v5512_v51 = vld [vmem:[%s8184_s1 + $0x360] ss:$16 sps:$4 sm:$0xff]  }
  0x33   :  { %1294 = vmatpush1.bf16.msra.mxu0 %v5423_v52  ;;  %1458 = vmatpush1.bf16.msra.mxu1 %v5424_v53  ;;  %v5515_v52 = vld [vmem:[%s8184_s1 + $0x368] ss:$16 sps:$4 sm:$0xff]   ;;  %v5520_v53 = vld [vmem:[%s8184_s1 + $0x384] ss:$16 sps:$4 sm:$0xff]  }
  0x34   :  { %1295 = vmatprep.subr.bf16.mxu0 %v5425_v54  ;;  %1459 = vmatprep.subr.bf16.mxu1 %v5427_v55  ;;  %v5523_v54 = vld [vmem:[%s8184_s1 + $0x38c] ss:$16 sps:$4 sm:$0xff]   ;;  %v5518_v55 = vld [vmem:[%s8184_s1 + $0x380] ss:$16 sps:$4 sm:$0xff]  }
  0x37   :  { %1296 = vmatpush1.bf16.msra.mxu0 %v5429_v56  ;;  %1460 = vmatpush1.bf16.msra.mxu1 %v5430_v57  ;;  %v5521_v56 = vld [vmem:[%s8184_s1 + $0x388] ss:$16 sps:$4 sm:$0xff]   ;;  %v5526_v57 = vld [vmem:[%s8184_s1 + $0x3a4] ss:$16 sps:$4 sm:$0xff]  }
  0x38   :  { %1297 = vmatprep.subr.bf16.mxu0 %v5431_v58  ;;  %1461 = vmatprep.subr.bf16.mxu1 %v5433_v59  ;;  %v5529_v58 = vld [vmem:[%s8184_s1 + $0x3ac] ss:$16 sps:$4 sm:$0xff]   ;;  %v5524_v59 = vld [vmem:[%s8184_s1 + $0x3a0] ss:$16 sps:$4 sm:$0xff]  }
  0x3b   :  { %1298 = vmatpush1.bf16.msra.mxu0 %v5435_v60  ;;  %1462 = vmatpush1.bf16.msra.mxu1 %v5436_v61  ;;  %v5527_v60 = vld [vmem:[%s8184_s1 + $0x3a8] ss:$16 sps:$4 sm:$0xff]   ;;  %v5532_v61 = vld [vmem:[%s8184_s1 + $0x3c4] ss:$16 sps:$4 sm:$0xff]  }
  0x3c   :  { %1299 = vmatprep.subr.bf16.mxu0 %v5437_v62  ;;  %1463 = vmatprep.subr.bf16.mxu1 %v5439_v63  ;;  %v5535_v62 = vld [vmem:[%s8184_s1 + $0x3cc] ss:$16 sps:$4 sm:$0xff]   ;;  %v5530_v63 = vld [vmem:[%s8184_s1 + $0x3c0] ss:$16 sps:$4 sm:$0xff]  }
  0x3f   :  { %1300 = vmatpush1.bf16.msra.mxu0 %v5441_v0  ;;  %1464 = vmatpush1.bf16.msra.mxu1 %v5442_v1  ;;  %v5533_v0 = vld [vmem:[%s8184_s1 + $0x3c8] ss:$16 sps:$4 sm:$0xff]   ;;  %v5538_v1 = vld [vmem:[%s8184_s1 + $0x3e4] ss:$16 sps:$4 sm:$0xff]  }
  0x40   :  { %1310 = vmatprep.subr.bf16.mxu0 %v5448_v2  ;;  %1474 = vmatprep.subr.bf16.mxu1 %v5451_v3  ;;  %v5541_v2 = vld [vmem:[%s8184_s1 + $0x3ec] ss:$16 sps:$4 sm:$0xff]   ;;  %v5536_v3 = vld [vmem:[%s8184_s1 + $0x3e0] ss:$16 sps:$4 sm:$0xff]  }
  0x42   :  { %1302 = vmatmul.mubr.bf16.vlgmr.msra.gmra.mrb[0].mxu0 %v4661_v4  ;;  %1466 = vmatmul.mubr.bf16.vlgmr.msra.gmra.mrb[0].mxu1 %v4661_v4  ;;  %v5539_v4 = vld [vmem:[%s8184_s1 + $0x3e8] ss:$16 sps:$4 sm:$0xff]  }
  0x43   :  { %1311 = vmatpush1.bf16.msra.mxu0 %v5446_v5  ;;  %1475 = vmatpush1.bf16.msra.mxu1 %v5449_v6  ;;  %v5546_v5 = vld [vmem:[%s8184_s1 + $0x404] ss:$16 sps:$4 sm:$0xff]   ;;  %v5549_v6 = vld [vmem:[%s8184_s1 + $0x40c] ss:$16 sps:$4 sm:$0xff]  }
  0x44   :  { %1312 = vmatprep.subr.bf16.mxu0 %v5454_v7  ;;  %1476 = vmatprep.subr.bf16.mxu1 %v5457_v8  ;;  %v4663_v7 = vcombine.low %v6573_v29, %v6573_v29  ;;  %v5544_v8 = vld [vmem:[%s8184_s1 + $0x400] ss:$16 sps:$4 sm:$0xff]   ;;  %v5579_v29 = vld [vmem:[%s8184_s1 + $0x4ac] ss:$16 sps:$4 sm:$0xff]  }
  0x45   :  { %1342 = vmatprep.mubr.bf16.mxu0 %v4664_v32  ;;  %1506 = vmatprep.mubr.bf16.mxu1 %v4664_v32  ;;  %v5582_v32 = vld [vmem:[%s8184_s1 + $0x4c4] ss:$16 sps:$4 sm:$0xff]  }
  0x47   :  { %1313 = vmatpush1.bf16.msra.mxu0 %v5452_v9  ;;  %1477 = vmatpush1.bf16.msra.mxu1 %v5455_v10  ;;  %v5547_v9 = vld [vmem:[%s8184_s1 + $0x408] ss:$16 sps:$4 sm:$0xff]   ;;  %v5552_v10 = vld [vmem:[%s8184_s1 + $0x424] ss:$16 sps:$4 sm:$0xff]  }
  0x48   :  { %1314 = vmatprep.subr.bf16.mxu0 %v5460_v11  ;;  %1478 = vmatprep.subr.bf16.mxu1 %v5463_v12  ;;  %v5555_v11 = vld [vmem:[%s8184_s1 + $0x42c] ss:$16 sps:$4 sm:$0xff]   ;;  %v6714_v12 = vld [vmem:[%s8185_s0 + $0x10] sm:$0xff] }
  0x4b   :  { %1315 = vmatpush1.bf16.msra.mxu0 %v5458_v13  ;;  %1479 = vmatpush1.bf16.msra.mxu1 %v5461_v14  ;;  %v4666_v13 = vcombine.high %v6714_v12, %v6714_v12  ;;  %v5550_v14 = vld [vmem:[%s8184_s1 + $0x420] ss:$16 sps:$4 sm:$0xff]  }
  0x4c   :  { %1316 = vmatprep.subr.bf16.mxu0 %v5466_v15  ;;  %1480 = vmatprep.subr.bf16.mxu1 %v5469_v16  ;;  %v5553_v15 = vld [vmem:[%s8184_s1 + $0x428] ss:$16 sps:$4 sm:$0xff]   ;;  %v5558_v16 = vld [vmem:[%s8184_s1 + $0x444] ss:$16 sps:$4 sm:$0xff]  }
  0x4f   :  { %1317 = vmatpush1.bf16.msra.mxu0 %v5464_v17  ;;  %1481 = vmatpush1.bf16.msra.mxu1 %v5467_v18  ;;  %v5561_v17 = vld [vmem:[%s8184_s1 + $0x44c] ss:$16 sps:$4 sm:$0xff]   ;;  %v5556_v18 = vld [vmem:[%s8184_s1 + $0x440] ss:$16 sps:$4 sm:$0xff]  }
  0x50   :  { %1318 = vmatprep.subr.bf16.mxu0 %v5472_v19  ;;  %1482 = vmatprep.subr.bf16.mxu1 %v5475_v20  ;;  %v5559_v19 = vld [vmem:[%s8184_s1 + $0x448] ss:$16 sps:$4 sm:$0xff]   ;;  %v5564_v20 = vld [vmem:[%s8184_s1 + $0x464] ss:$16 sps:$4 sm:$0xff]  }
  0x53   :  { %1319 = vmatpush1.bf16.msra.mxu0 %v5470_v21  ;;  %1483 = vmatpush1.bf16.msra.mxu1 %v5473_v22  ;;  %v5567_v21 = vld [vmem:[%s8184_s1 + $0x46c] ss:$16 sps:$4 sm:$0xff]   ;;  %v5562_v22 = vld [vmem:[%s8184_s1 + $0x460] ss:$16 sps:$4 sm:$0xff]  }
  0x54   :  { %1320 = vmatprep.subr.bf16.mxu0 %v5478_v23  ;;  %1484 = vmatprep.subr.bf16.mxu1 %v5481_v24  ;;  %v5565_v23 = vld [vmem:[%s8184_s1 + $0x468] ss:$16 sps:$4 sm:$0xff]   ;;  %v5570_v24 = vld [vmem:[%s8184_s1 + $0x484] ss:$16 sps:$4 sm:$0xff]  }
  0x57   :  { %1321 = vmatpush1.bf16.msra.mxu0 %v5476_v25  ;;  %1485 = vmatpush1.bf16.msra.mxu1 %v5479_v26  ;;  %v5573_v25 = vld [vmem:[%s8184_s1 + $0x48c] ss:$16 sps:$4 sm:$0xff]   ;;  %v5568_v26 = vld [vmem:[%s8184_s1 + $0x480] ss:$16 sps:$4 sm:$0xff]  }
  0x58   :  { %1322 = vmatprep.subr.bf16.mxu0 %v5484_v27  ;;  %1486 = vmatprep.subr.bf16.mxu1 %v5487_v28  ;;  %v5571_v27 = vld [vmem:[%s8184_s1 + $0x488] ss:$16 sps:$4 sm:$0xff]   ;;  %v5576_v28 = vld [vmem:[%s8184_s1 + $0x4a4] ss:$16 sps:$4 sm:$0xff]  }
  0x5b   :  { %1323 = vmatpush1.bf16.msra.mxu0 %v5482_v30  ;;  %1487 = vmatpush1.bf16.msra.mxu1 %v5485_v31  ;;  %v5574_v30 = vld [vmem:[%s8184_s1 + $0x4a0] ss:$16 sps:$4 sm:$0xff]   ;;  %v5577_v31 = vld [vmem:[%s8184_s1 + $0x4a8] ss:$16 sps:$4 sm:$0xff]  }
  0x5c   :  { %1324 = vmatprep.subr.bf16.mxu0 %v5490_v33  ;;  %1488 = vmatprep.subr.bf16.mxu1 %v5493_v34  ;;  %v5585_v33 = vld [vmem:[%s8184_s1 + $0x4cc] ss:$16 sps:$4 sm:$0xff]   ;;  %v5580_v34 = vld [vmem:[%s8184_s1 + $0x4c0] ss:$16 sps:$4 sm:$0xff]  }
  0x5f   :  { %1325 = vmatpush1.bf16.msra.mxu0 %v5488_v35  ;;  %1489 = vmatpush1.bf16.msra.mxu1 %v5491_v36  ;;  %v5583_v35 = vld [vmem:[%s8184_s1 + $0x4c8] ss:$16 sps:$4 sm:$0xff]   ;;  %v5588_v36 = vld [vmem:[%s8184_s1 + $0x4e4] ss:$16 sps:$4 sm:$0xff]  }
  0x60   :  { %1326 = vmatprep.subr.bf16.mxu0 %v5496_v37  ;;  %1490 = vmatprep.subr.bf16.mxu1 %v5499_v38  ;;  %v5591_v37 = vld [vmem:[%s8184_s1 + $0x4ec] ss:$16 sps:$4 sm:$0xff]   ;;  %v5586_v38 = vld [vmem:[%s8184_s1 + $0x4e0] ss:$16 sps:$4 sm:$0xff]  }
  0x63   :  { %1327 = vmatpush1.bf16.msra.mxu0 %v5494_v39  ;;  %1491 = vmatpush1.bf16.msra.mxu1 %v5497_v40  ;;  %v5589_v39 = vld [vmem:[%s8184_s1 + $0x4e8] ss:$16 sps:$4 sm:$0xff]   ;;  %v5594_v40 = vld [vmem:[%s8184_s1 + $0x504] ss:$16 sps:$4 sm:$0xff]  }
  0x64   :  { %1328 = vmatprep.subr.bf16.mxu0 %v5502_v41  ;;  %1492 = vmatprep.subr.bf16.mxu1 %v5505_v42  ;;  %v5597_v41 = vld [vmem:[%s8184_s1 + $0x50c] ss:$16 sps:$4 sm:$0xff]   ;;  %v5592_v42 = vld [vmem:[%s8184_s1 + $0x500] ss:$16 sps:$4 sm:$0xff]  }
  0x67   :  { %1329 = vmatpush1.bf16.msra.mxu0 %v5500_v43  ;;  %1493 = vmatpush1.bf16.msra.mxu1 %v5503_v44  ;;  %v5595_v43 = vld [vmem:[%s8184_s1 + $0x508] ss:$16 sps:$4 sm:$0xff]   ;;  %v5600_v44 = vld [vmem:[%s8184_s1 + $0x524] ss:$16 sps:$4 sm:$0xff]  }
  0x68   :  { %1330 = vmatprep.subr.bf16.mxu0 %v5508_v45  ;;  %1494 = vmatprep.subr.bf16.mxu1 %v5511_v46  ;;  %v5603_v45 = vld [vmem:[%s8184_s1 + $0x52c] ss:$16 sps:$4 sm:$0xff]   ;;  %v5598_v46 = vld [vmem:[%s8184_s1 + $0x520] ss:$16 sps:$4 sm:$0xff]  }
  0x6b   :  { %1331 = vmatpush1.bf16.msra.mxu0 %v5506_v47  ;;  %1495 = vmatpush1.bf16.msra.mxu1 %v5509_v48  ;;  %v5601_v47 = vld [vmem:[%s8184_s1 + $0x528] ss:$16 sps:$4 sm:$0xff]   ;;  %v5606_v48 = vld [vmem:[%s8184_s1 + $0x544] ss:$16 sps:$4 sm:$0xff]  }
  0x6c   :  { %1332 = vmatprep.subr.bf16.mxu0 %v5514_v49  ;;  %1496 = vmatprep.subr.bf16.mxu1 %v5517_v50  ;;  %v5609_v49 = vld [vmem:[%s8184_s1 + $0x54c] ss:$16 sps:$4 sm:$0xff]   ;;  %v5604_v50 = vld [vmem:[%s8184_s1 + $0x540] ss:$16 sps:$4 sm:$0xff]  }
  0x6f   :  { %1333 = vmatpush1.bf16.msra.mxu0 %v5512_v51  ;;  %1497 = vmatpush1.bf16.msra.mxu1 %v5515_v52  ;;  %v5607_v51 = vld [vmem:[%s8184_s1 + $0x548] ss:$16 sps:$4 sm:$0xff]   ;;  %v5612_v52 = vld [vmem:[%s8184_s1 + $0x564] ss:$16 sps:$4 sm:$0xff]  }
  0x70   :  { %1334 = vmatprep.subr.bf16.mxu0 %v5520_v53  ;;  %1498 = vmatprep.subr.bf16.mxu1 %v5523_v54  ;;  %v5615_v53 = vld [vmem:[%s8184_s1 + $0x56c] ss:$16 sps:$4 sm:$0xff]   ;;  %v5610_v54 = vld [vmem:[%s8184_s1 + $0x560] ss:$16 sps:$4 sm:$0xff]  }
  0x73   :  { %1335 = vmatpush1.bf16.msra.mxu0 %v5518_v55  ;;  %1499 = vmatpush1.bf16.msra.mxu1 %v5521_v56  ;;  %v5613_v55 = vld [vmem:[%s8184_s1 + $0x568] ss:$16 sps:$4 sm:$0xff]   ;;  %v5618_v56 = vld [vmem:[%s8184_s1 + $0x584] ss:$16 sps:$4 sm:$0xff]  }
  0x74   :  { %1336 = vmatprep.subr.bf16.mxu0 %v5526_v57  ;;  %1500 = vmatprep.subr.bf16.mxu1 %v5529_v58  ;;  %v5621_v57 = vld [vmem:[%s8184_s1 + $0x58c] ss:$16 sps:$4 sm:$0xff]   ;;  %v5616_v58 = vld [vmem:[%s8184_s1 + $0x580] ss:$16 sps:$4 sm:$0xff]  }
  0x77   :  { %1337 = vmatpush1.bf16.msra.mxu0 %v5524_v59  ;;  %1501 = vmatpush1.bf16.msra.mxu1 %v5527_v60  ;;  %v5619_v59 = vld [vmem:[%s8184_s1 + $0x588] ss:$16 sps:$4 sm:$0xff]   ;;  %v5624_v60 = vld [vmem:[%s8184_s1 + $0x5a4] ss:$16 sps:$4 sm:$0xff]  }
  0x78   :  { %1338 = vmatprep.subr.bf16.mxu0 %v5532_v61  ;;  %1502 = vmatprep.subr.bf16.mxu1 %v5535_v62  ;;  %v5627_v61 = vld [vmem:[%s8184_s1 + $0x5ac] ss:$16 sps:$4 sm:$0xff]   ;;  %v5622_v62 = vld [vmem:[%s8184_s1 + $0x5a0] ss:$16 sps:$4 sm:$0xff]  }
  0x7b   :  { %1339 = vmatpush1.bf16.msra.mxu0 %v5530_v63  ;;  %1503 = vmatpush1.bf16.msra.mxu1 %v5533_v0  ;;  %v5625_v63 = vld [vmem:[%s8184_s1 + $0x5a8] ss:$16 sps:$4 sm:$0xff]   ;;  %v5630_v0 = vld [vmem:[%s8184_s1 + $0x5c4] ss:$16 sps:$4 sm:$0xff]  }
  0x7c   :  { %1340 = vmatprep.subr.bf16.mxu0 %v5538_v1  ;;  %1504 = vmatprep.subr.bf16.mxu1 %v5541_v2  ;;  %v5633_v1 = vld [vmem:[%s8184_s1 + $0x5cc] ss:$16 sps:$4 sm:$0xff]   ;;  %v5628_v2 = vld [vmem:[%s8184_s1 + $0x5c0] ss:$16 sps:$4 sm:$0xff]  }
  0x7f   :  { %1341 = vmatpush1.bf16.msra.mxu0 %v5536_v3  ;;  %1505 = vmatpush1.bf16.msra.mxu1 %v5539_v4  ;;  %v5631_v3 = vld [vmem:[%s8184_s1 + $0x5c8] ss:$16 sps:$4 sm:$0xff]   ;;  %v5636_v4 = vld [vmem:[%s8184_s1 + $0x5e4] ss:$16 sps:$4 sm:$0xff]  }
  0x80   :  { %1351 = vmatprep.subr.bf16.mxu0 %v5546_v5  ;;  %1515 = vmatprep.subr.bf16.mxu1 %v5549_v6  ;;  %v5639_v5 = vld [vmem:[%s8184_s1 + $0x5ec] ss:$16 sps:$4 sm:$0xff]   ;;  %v5634_v6 = vld [vmem:[%s8184_s1 + $0x5e0] ss:$16 sps:$4 sm:$0xff]  }
  0x82   :  { %1343 = vmatmul.mubr.bf16.vlgmr.msra.gmra.mrb[0].mxu0 %v4663_v7  ;;  %1507 = vmatmul.mubr.bf16.vlgmr.msra.gmra.mrb[0].mxu1 %v4663_v7  ;;  %v5637_v7 = vld [vmem:[%s8184_s1 + $0x5e8] ss:$16 sps:$4 sm:$0xff]  }
  0x83   :  { %1352 = vmatpush1.bf16.msra.mxu0 %v5544_v8  ;;  %1516 = vmatpush1.bf16.msra.mxu1 %v5547_v9  ;;  %v5644_v8 = vld [vmem:[%s8184_s1 + $0x604] ss:$16 sps:$4 sm:$0xff]   ;;  %v5647_v9 = vld [vmem:[%s8184_s1 + $0x60c] ss:$16 sps:$4 sm:$0xff]  }
  0x84   :  { %1353 = vmatprep.subr.bf16.mxu0 %v5552_v10  ;;  %1517 = vmatprep.subr.bf16.mxu1 %v5555_v11  ;;  %v4665_v10 = vcombine.low %v6714_v12, %v6714_v12  ;;  %v5642_v11 = vld [vmem:[%s8184_s1 + $0x600] ss:$16 sps:$4 sm:$0xff]   ;;  %v6236_v12 = vmov 0  }
  0x85   :  { %1383 = vmatprep.mubr.bf16.mxu0 %v4666_v13  ;;  %1547 = vmatprep.mubr.bf16.mxu1 %v4666_v13  ;;  %v5645_v13 = vld [vmem:[%s8184_s1 + $0x608] ss:$16 sps:$4 sm:$0xff]  }
  0x87   :  { %1354 = vmatpush1.bf16.msra.mxu0 %v5550_v14  ;;  %1518 = vmatpush1.bf16.msra.mxu1 %v5553_v15  ;;  %v5650_v14 = vld [vmem:[%s8186_s3 + $0x4] ss:$8 sps:$4 sm:$0xff]   ;;  %v5445_v15 = vld [vmem:[%s8185_s0 + $0x18] ss:$0 sps:$4 sm:$0xff]  }
  0x88   :  { %1355 = vmatprep.subr.bf16.mxu0 %v5558_v16  ;;  %1519 = vmatprep.subr.bf16.mxu1 %v5561_v17  ;;  %v5648_v16 = vld [vmem:[%s8186_s3] ss:$8 sps:$4 sm:$0xff]   ;;  %v5653_v17 = vld [vmem:[%s8186_s3 + $0x14] ss:$8 sps:$4 sm:$0xff]  }
  0x8b   :  { %1356 = vmatpush1.bf16.msra.mxu0 %v5556_v18  ;;  %1520 = vmatpush1.bf16.msra.mxu1 %v5559_v19  ;;  %v5651_v18 = vld [vmem:[%s8186_s3 + $0x10] ss:$8 sps:$4 sm:$0xff]   ;;  %v5656_v19 = vld [vmem:[%s8186_s3 + $0x24] ss:$8 sps:$4 sm:$0xff]  }
  0x8c   :  { %1357 = vmatprep.subr.bf16.mxu0 %v5564_v20  ;;  %1521 = vmatprep.subr.bf16.mxu1 %v5567_v21  ;;  %v5654_v20 = vld [vmem:[%s8186_s3 + $0x20] ss:$8 sps:$4 sm:$0xff]   ;;  %v5659_v21 = vld [vmem:[%s8186_s3 + $0x34] ss:$8 sps:$4 sm:$0xff]  }
  0x8f   :  { %1358 = vmatpush1.bf16.msra.mxu0 %v5562_v22  ;;  %1522 = vmatpush1.bf16.msra.mxu1 %v5565_v23  ;;  %v5657_v22 = vld [vmem:[%s8186_s3 + $0x30] ss:$8 sps:$4 sm:$0xff]   ;;  %v5662_v23 = vld [vmem:[%s8186_s3 + $0x44] ss:$8 sps:$4 sm:$0xff]  }
  0x90   :  { %1359 = vmatprep.subr.bf16.mxu0 %v5570_v24  ;;  %1523 = vmatprep.subr.bf16.mxu1 %v5573_v25  ;;  %v5660_v24 = vld [vmem:[%s8186_s3 + $0x40] ss:$8 sps:$4 sm:$0xff]   ;;  %v5665_v25 = vld [vmem:[%s8186_s3 + $0x54] ss:$8 sps:$4 sm:$0xff]  }
  0x93   :  { %1360 = vmatpush1.bf16.msra.mxu0 %v5568_v26  ;;  %1524 = vmatpush1.bf16.msra.mxu1 %v5571_v27  ;;  %v5663_v26 = vld [vmem:[%s8186_s3 + $0x50] ss:$8 sps:$4 sm:$0xff]   ;;  %v5668_v27 = vld [vmem:[%s8186_s3 + $0x64] ss:$8 sps:$4 sm:$0xff]  }
  0x94   :  { %1361 = vmatprep.subr.bf16.mxu0 %v5576_v28  ;;  %1525 = vmatprep.subr.bf16.mxu1 %v5579_v29  ;;  %v5666_v28 = vld [vmem:[%s8186_s3 + $0x60] ss:$8 sps:$4 sm:$0xff]   ;;  %v5671_v29 = vld [vmem:[%s8186_s3 + $0x74] ss:$8 sps:$4 sm:$0xff]  }
  0x97   :  { %1362 = vmatpush1.bf16.msra.mxu0 %v5574_v30  ;;  %1526 = vmatpush1.bf16.msra.mxu1 %v5577_v31  ;;  %v5669_v30 = vld [vmem:[%s8186_s3 + $0x70] ss:$8 sps:$4 sm:$0xff]   ;;  %v5674_v31 = vld [vmem:[%s8186_s3 + $0x84] ss:$8 sps:$4 sm:$0xff]  }
  0x98   :  { %1363 = vmatprep.subr.bf16.mxu0 %v5582_v32  ;;  %1527 = vmatprep.subr.bf16.mxu1 %v5585_v33  ;;  %v5672_v32 = vld [vmem:[%s8186_s3 + $0x80] ss:$8 sps:$4 sm:$0xff]   ;;  %v5677_v33 = vld [vmem:[%s8186_s3 + $0x94] ss:$8 sps:$4 sm:$0xff]  }
  0x9b   :  { %1364 = vmatpush1.bf16.msra.mxu0 %v5580_v34  ;;  %1528 = vmatpush1.bf16.msra.mxu1 %v5583_v35  ;;  %v5675_v34 = vld [vmem:[%s8186_s3 + $0x90] ss:$8 sps:$4 sm:$0xff]   ;;  %v5680_v35 = vld [vmem:[%s8186_s3 + $0xa4] ss:$8 sps:$4 sm:$0xff]  }
  0x9c   :  { %1365 = vmatprep.subr.bf16.mxu0 %v5588_v36  ;;  %1529 = vmatprep.subr.bf16.mxu1 %v5591_v37  ;;  %v5678_v36 = vld [vmem:[%s8186_s3 + $0xa0] ss:$8 sps:$4 sm:$0xff]   ;;  %v5683_v37 = vld [vmem:[%s8186_s3 + $0xb4] ss:$8 sps:$4 sm:$0xff]  }
  0x9f   :  { %1366 = vmatpush1.bf16.msra.mxu0 %v5586_v38  ;;  %1530 = vmatpush1.bf16.msra.mxu1 %v5589_v39  ;;  %v5681_v38 = vld [vmem:[%s8186_s3 + $0xb0] ss:$8 sps:$4 sm:$0xff]   ;;  %v5686_v39 = vld [vmem:[%s8186_s3 + $0xc4] ss:$8 sps:$4 sm:$0xff]  }
  0xa0   :  { %1367 = vmatprep.subr.bf16.mxu0 %v5594_v40  ;;  %1531 = vmatprep.subr.bf16.mxu1 %v5597_v41  ;;  %v5684_v40 = vld [vmem:[%s8186_s3 + $0xc0] ss:$8 sps:$4 sm:$0xff]   ;;  %v5689_v41 = vld [vmem:[%s8186_s3 + $0xd4] ss:$8 sps:$4 sm:$0xff]  }
  0xa3   :  { %1368 = vmatpush1.bf16.msra.mxu0 %v5592_v42  ;;  %1532 = vmatpush1.bf16.msra.mxu1 %v5595_v43  ;;  %v5687_v42 = vld [vmem:[%s8186_s3 + $0xd0] ss:$8 sps:$4 sm:$0xff]   ;;  %v5692_v43 = vld [vmem:[%s8186_s3 + $0xe4] ss:$8 sps:$4 sm:$0xff]  }
  0xa4   :  { %1369 = vmatprep.subr.bf16.mxu0 %v5600_v44  ;;  %1533 = vmatprep.subr.bf16.mxu1 %v5603_v45  ;;  %v5690_v44 = vld [vmem:[%s8186_s3 + $0xe0] ss:$8 sps:$4 sm:$0xff]   ;;  %v5695_v45 = vld [vmem:[%s8186_s3 + $0xf4] ss:$8 sps:$4 sm:$0xff]  }
  0xa7   :  { %1370 = vmatpush1.bf16.msra.mxu0 %v5598_v46  ;;  %1534 = vmatpush1.bf16.msra.mxu1 %v5601_v47  ;;  %v5693_v46 = vld [vmem:[%s8186_s3 + $0xf0] ss:$8 sps:$4 sm:$0xff]   ;;  %v5698_v47 = vld [vmem:[%s8186_s3 + $0x104] ss:$8 sps:$4 sm:$0xff]  }
  0xa8   :  { %1371 = vmatprep.subr.bf16.mxu0 %v5606_v48  ;;  %1535 = vmatprep.subr.bf16.mxu1 %v5609_v49  ;;  %v5744_v48 = vld [vmem:[%s8187_s5] ss:$8 sps:$4 sm:$0xff]   ;;  %v5746_v49 = vld [vmem:[%s8187_s5 + $0x4] ss:$8 sps:$4 sm:$0xff]  }
  0xab   :  { %1372 = vmatpush1.bf16.msra.mxu0 %v5604_v50  ;;  %1536 = vmatpush1.bf16.msra.mxu1 %v5607_v51  ;;  %v5749_v50 = vld [vmem:[%s8187_s5 + $0x14] ss:$8 sps:$4 sm:$0xff]   ;;  %v5747_v51 = vld [vmem:[%s8187_s5 + $0x10] ss:$8 sps:$4 sm:$0xff]  }
  0xac   :  { %1373 = vmatprep.subr.bf16.mxu0 %v5612_v52  ;;  %1537 = vmatprep.subr.bf16.mxu1 %v5615_v53  ;;  %v5752_v52 = vld [vmem:[%s8187_s5 + $0x24] ss:$8 sps:$4 sm:$0xff]   ;;  %v5750_v53 = vld [vmem:[%s8187_s5 + $0x20] ss:$8 sps:$4 sm:$0xff]  }
  0xaf   :  { %1374 = vmatpush1.bf16.msra.mxu0 %v5610_v54  ;;  %1538 = vmatpush1.bf16.msra.mxu1 %v5613_v55  ;;  %v5755_v54 = vld [vmem:[%s8187_s5 + $0x34] ss:$8 sps:$4 sm:$0xff]   ;;  %v5753_v55 = vld [vmem:[%s8187_s5 + $0x30] ss:$8 sps:$4 sm:$0xff]  }
  0xb0   :  { %1375 = vmatprep.subr.bf16.mxu0 %v5618_v56  ;;  %1539 = vmatprep.subr.bf16.mxu1 %v5621_v57  ;;  %v5758_v56 = vld [vmem:[%s8187_s5 + $0x44] ss:$8 sps:$4 sm:$0xff]   ;;  %v5756_v57 = vld [vmem:[%s8187_s5 + $0x40] ss:$8 sps:$4 sm:$0xff]  }
  0xb3   :  { %1376 = vmatpush1.bf16.msra.mxu0 %v5616_v58  ;;  %1540 = vmatpush1.bf16.msra.mxu1 %v5619_v59  ;;  %v5761_v58 = vld [vmem:[%s8187_s5 + $0x54] ss:$8 sps:$4 sm:$0xff]   ;;  %v5759_v59 = vld [vmem:[%s8187_s5 + $0x50] ss:$8 sps:$4 sm:$0xff]  }
  0xb4   :  { %1377 = vmatprep.subr.bf16.mxu0 %v5624_v60  ;;  %1541 = vmatprep.subr.bf16.mxu1 %v5627_v61  ;;  %v5764_v60 = vld [vmem:[%s8187_s5 + $0x64] ss:$8 sps:$4 sm:$0xff]   ;;  %v5762_v61 = vld [vmem:[%s8187_s5 + $0x60] ss:$8 sps:$4 sm:$0xff]  }
  0xb7   :  { %1378 = vmatpush1.bf16.msra.mxu0 %v5622_v62  ;;  %1542 = vmatpush1.bf16.msra.mxu1 %v5625_v63  ;;  %v5767_v62 = vld [vmem:[%s8187_s5 + $0x74] ss:$8 sps:$4 sm:$0xff]   ;;  %v5765_v63 = vld [vmem:[%s8187_s5 + $0x70] ss:$8 sps:$4 sm:$0xff]  }
  0xb8   :  { %1379 = vmatprep.subr.bf16.mxu0 %v5630_v0  ;;  %1543 = vmatprep.subr.bf16.mxu1 %v5633_v1  ;;  %v5770_v0 = vld [vmem:[%s8187_s5 + $0x84] ss:$8 sps:$4 sm:$0xff]   ;;  %v5768_v1 = vld [vmem:[%s8187_s5 + $0x80] ss:$8 sps:$4 sm:$0xff]  }
  0xbb   :  { %1380 = vmatpush1.bf16.msra.mxu0 %v5628_v2  ;;  %1544 = vmatpush1.bf16.msra.mxu1 %v5631_v3  ;;  %v5773_v2 = vld [vmem:[%s8187_s5 + $0x94] ss:$8 sps:$4 sm:$0xff]   ;;  %v5771_v3 = vld [vmem:[%s8187_s5 + $0x90] ss:$8 sps:$4 sm:$0xff]  }
  0xbc   :  { %1381 = vmatprep.subr.bf16.mxu0 %v5636_v4  ;;  %1545 = vmatprep.subr.bf16.mxu1 %v5639_v5  ;;  %v241_v4 = vlaneseq  ;;  %v5776_v5 = vld [vmem:[%s8187_s5 + $0xa4] ss:$8 sps:$4 sm:$0xff]  }
  0xbf   :  { %1382 = vmatpush1.bf16.msra.mxu0 %v5634_v6  ;;  %1546 = vmatpush1.bf16.msra.mxu1 %v5637_v7  ;;  %v5774_v6 = vld [vmem:[%s8187_s5 + $0xa0] ss:$8 sps:$4 sm:$0xff]   ;;  %v7076_v7 = vshrl.u32 %v241_v4, 7  ;;  %v5737_v4 = vld [vmem:[%s8186_s3 + $0x1d4] ss:$8 sps:$4 sm:$0xff]  }
  0xc0   :  { %1392 = vmatprep.subr.bf16.mxu0 %v5644_v8  ;;  %1556 = vmatprep.subr.bf16.mxu1 %v5647_v9  ;;  %v5779_v8 = vld [vmem:[%s8187_s5 + $0xb4] ss:$8 sps:$4 sm:$0xff]   ;;  %v5777_v9 = vld [vmem:[%s8187_s5 + $0xb0] ss:$8 sps:$4 sm:$0xff]  }
  0xc2   :  { %1384 = vmatmul.mubr.bf16.vlgmr.msra.gmra.mrb[0].mxu0 %v4665_v10  ;;  %1548 = vmatmul.mubr.bf16.vlgmr.msra.gmra.mrb[0].mxu1 %v4665_v10  ;;  %v7085_v10 = vsub.s32 0, %v7076_v7 }
  0xc3   :  { %1393 = vmatpush1.bf16.msra.mxu0 %v5642_v11  ;;  %1557 = vmatpush1.bf16.msra.mxu1 %v5645_v13  ;;  %v5782_v11 = vld [vmem:[%s8187_s5 + $0xc4] ss:$8 sps:$4 sm:$0xff]   ;;  %v7093_v13 = vld [vmem:[%s8188_s2] sm:$0xf] }
  0xc4   :  { %1424 = vmatprep.mubr.bf16.mxu0 %v6236_v12  ;;  %1588 = vmatprep.mubr.bf16.mxu1 %v6236_v12  ;;  %v7099_v12 = vsub.s32 3, %v7076_v7 }
  0xc5   :  { %2005 = vmatprep.subr.bf16.mxu0 %v5650_v14  ;;  %2297 = vmatprep.subr.bf16.mxu1 %v5746_v49  ;;  %v7096_v14 = vsub.s32 1, %v7076_v7  ;;  %v5708_v49 = vld [vmem:[%s8186_s3 + $0x140] ss:$8 sps:$4 sm:$0xff]  }
  0xce   :  { %4864 = vmatmul.mubr.msk.bf16.vlgmr.msra.gmra.mrb[0].mxu0 %vm1265_vm0, %v5445_v15  ;;  %4865 = vmatmul.mubr.msk.bf16.vlgmr.msra.gmra.mrb[0].mxu1 %vm1265_vm0, %v5445_v15  ;;  %v5780_v15 = vld [vmem:[%s8187_s5 + $0xc0] ss:$8 sps:$4 sm:$0xff]  }
  0xcf   :  { %2006 = vmatpush1.bf16.msra.mxu0 %v5648_v16  ;;  %2298 = vmatpush1.bf16.msra.mxu1 %v5744_v48  ;;  %v244_v16 = vrot.slane %v7093_v13, %v7085_v10  ;;  %v5710_v48 = vld [vmem:[%s8186_s3 + $0x144] ss:$8 sps:$4 sm:$0xff]  }
  0xd0   :  { %2007 = vmatprep.subr.bf16.mxu0 %v5653_v17  ;;  %2299 = vmatprep.subr.bf16.mxu1 %v5749_v50  ;;  %v5785_v17 = vld [vmem:[%s8187_s5 + $0xd4] ss:$8 sps:$4 sm:$0xff]  }
  0xd1   :  { %v5713_v50 = vld [vmem:[%s8186_s3 + $0x154] ss:$8 sps:$4 sm:$0xff]  }
  0xd3   :  { %2008 = vmatpush1.bf16.msra.mxu0 %v5651_v18  ;;  %2300 = vmatpush1.bf16.msra.mxu1 %v5747_v51  ;;  %v248_v18 = vrot.slane %v7093_v13, %v7096_v14  ;;  %v5711_v51 = vld [vmem:[%s8186_s3 + $0x150] ss:$8 sps:$4 sm:$0xff]  }
  0xd4   :  { %2009 = vmatprep.subr.bf16.mxu0 %v5656_v19  ;;  %2301 = vmatprep.subr.bf16.mxu1 %v5752_v52  ;;  %v256_v19 = vrot.slane %v7093_v13, %v7099_v12  ;;  %v5716_v52 = vld [vmem:[%s8186_s3 + $0x164] ss:$8 sps:$4 sm:$0xff]  }
  0xd7   :  { %2010 = vmatpush1.bf16.msra.mxu0 %v5654_v20  ;;  %2302 = vmatpush1.bf16.msra.mxu1 %v5750_v53  ;;  %v5714_v53 = vld [vmem:[%s8186_s3 + $0x160] ss:$8 sps:$4 sm:$0xff]  }
  0xd8   :  { %2011 = vmatprep.subr.bf16.mxu0 %v5659_v21  ;;  %2303 = vmatprep.subr.bf16.mxu1 %v5755_v54  ;;  %v5719_v54 = vld [vmem:[%s8186_s3 + $0x174] ss:$8 sps:$4 sm:$0xff]  }
  0xdb   :  { %2012 = vmatpush1.bf16.msra.mxu0 %v5657_v22  ;;  %2304 = vmatpush1.bf16.msra.mxu1 %v5753_v55  ;;  %v5783_v22 = vld [vmem:[%s8187_s5 + $0xd0] ss:$8 sps:$4 sm:$0xff]  }
  0xdc   :  { %2013 = vmatprep.subr.bf16.mxu0 %v5662_v23  ;;  %2305 = vmatprep.subr.bf16.mxu1 %v5758_v56  ;;  %v5717_v55 = vld [vmem:[%s8186_s3 + $0x170] ss:$8 sps:$4 sm:$0xff]   ;;  %v5722_v56 = vld [vmem:[%s8186_s3 + $0x184] ss:$8 sps:$4 sm:$0xff]  }
  0xdf   :  { %2014 = vmatpush1.bf16.msra.mxu0 %v5660_v24  ;;  %2306 = vmatpush1.bf16.msra.mxu1 %v5756_v57  ;;  %v5720_v57 = vld [vmem:[%s8186_s3 + $0x180] ss:$8 sps:$4 sm:$0xff]  }
  0xe0   :  { %2015 = vmatprep.subr.bf16.mxu0 %v5665_v25  ;;  %2307 = vmatprep.subr.bf16.mxu1 %v5761_v58  ;;  %v5725_v58 = vld [vmem:[%s8186_s3 + $0x194] ss:$8 sps:$4 sm:$0xff]  }
  0xe3   :  { %2016 = vmatpush1.bf16.msra.mxu0 %v5663_v26  ;;  %2308 = vmatpush1.bf16.msra.mxu1 %v5759_v59  ;;  %v5723_v59 = vld [vmem:[%s8186_s3 + $0x190] ss:$8 sps:$4 sm:$0xff]  }
  0xe4   :  { %2017 = vmatprep.subr.bf16.mxu0 %v5668_v27  ;;  %2309 = vmatprep.subr.bf16.mxu1 %v5764_v60  ;;  %v5728_v60 = vld [vmem:[%s8186_s3 + $0x1a4] ss:$8 sps:$4 sm:$0xff]  }
  0xe7   :  { %2018 = vmatpush1.bf16.msra.mxu0 %v5666_v28  ;;  %2310 = vmatpush1.bf16.msra.mxu1 %v5762_v61  ;;  %v5726_v61 = vld [vmem:[%s8186_s3 + $0x1a0] ss:$8 sps:$4 sm:$0xff]  }
  0xe8   :  { %2019 = vmatprep.subr.bf16.mxu0 %v5671_v29  ;;  %2311 = vmatprep.subr.bf16.mxu1 %v5767_v62  ;;  %v5731_v62 = vld [vmem:[%s8186_s3 + $0x1b4] ss:$8 sps:$4 sm:$0xff]  }
  0xeb   :  { %2020 = vmatpush1.bf16.msra.mxu0 %v5669_v30  ;;  %2312 = vmatpush1.bf16.msra.mxu1 %v5765_v63  ;;  %v5729_v63 = vld [vmem:[%s8186_s3 + $0x1b0] ss:$8 sps:$4 sm:$0xff]  }
  0xec   :  { %2021 = vmatprep.subr.bf16.mxu0 %v5674_v31  ;;  %2313 = vmatprep.subr.bf16.mxu1 %v5770_v0  ;;  %v7188_v0 = vsub.s32 2, %v7076_v7 }
  0xef   :  { %2022 = vmatpush1.bf16.msra.mxu0 %v5672_v32  ;;  %2314 = vmatpush1.bf16.msra.mxu1 %v5768_v1  ;;  %v5734_v1 = vld [vmem:[%s8186_s3 + $0x1c4] ss:$8 sps:$4 sm:$0xff]  }
  0xf0   :  { %2023 = vmatprep.subr.bf16.mxu0 %v5677_v33  ;;  %2315 = vmatprep.subr.bf16.mxu1 %v5773_v2  ;;  %v5732_v2 = vld [vmem:[%s8186_s3 + $0x1c0] ss:$8 sps:$4 sm:$0xff]  }
  0xf3   :  { %2024 = vmatpush1.bf16.msra.mxu0 %v5675_v34  ;;  %2316 = vmatpush1.bf16.msra.mxu1 %v5771_v3  ;;  %v252_v3 = vrot.slane %v7093_v13, %v7188_v0  ;;  %v5743_v13 = vld [vmem:[%s8186_s3 + $0x1f4] ss:$8 sps:$4 sm:$0xff]  }
  0xf4   :  { %2025 = vmatprep.subr.bf16.mxu0 %v5680_v35  ;;  %2317 = vmatprep.subr.bf16.mxu1 %v5776_v5  ;;  %v5735_v5 = vld [vmem:[%s8186_s3 + $0x1d0] ss:$8 sps:$4 sm:$0xff]  }
  0xf7   :  { %2026 = vmatpush1.bf16.msra.mxu0 %v5678_v36  ;;  %2318 = vmatpush1.bf16.msra.mxu1 %v5774_v6 }
  0xf8   :  { %2027 = vmatprep.subr.bf16.mxu0 %v5683_v37  ;;  %2319 = vmatprep.subr.bf16.mxu1 %v5779_v8  ;;  %v5740_v8 = vld [vmem:[%s8186_s3 + $0x1e4] ss:$8 sps:$4 sm:$0xff]  }
  0xfb   :  { %2028 = vmatpush1.bf16.msra.mxu0 %v5681_v38  ;;  %2320 = vmatpush1.bf16.msra.mxu1 %v5777_v9  ;;  %v5738_v9 = vld [vmem:[%s8186_s3 + $0x1e0] ss:$8 sps:$4 sm:$0xff]  }
  0xfc   :  { %2029 = vmatprep.subr.bf16.mxu0 %v5686_v39  ;;  %2321 = vmatprep.subr.bf16.mxu1 %v5782_v11  ;;  %v5696_v39 = vld [vmem:[%s8186_s3 + $0x100] ss:$8 sps:$4 sm:$0xff]  }
  0xff   :  { %2030 = vmatpush1.bf16.msra.mxu0 %v5684_v40  ;;  %2322 = vmatpush1.bf16.msra.mxu1 %v5780_v15  ;;  %v5741_v15 = vld [vmem:[%s8186_s3 + $0x1f0] ss:$8 sps:$4 sm:$0xff]  }
 0x100   :  { %2031 = vmatprep.subr.bf16.mxu0 %v5689_v41  ;;  %2323 = vmatprep.subr.bf16.mxu1 %v5785_v17  ;;  %v5701_v41 = vld [vmem:[%s8186_s3 + $0x114] ss:$8 sps:$4 sm:$0xff]  }
 0x103   :  { %2032 = vmatpush1.bf16.msra.mxu0 %v5687_v42  ;;  %2324 = vmatpush1.bf16.msra.mxu1 %v5783_v22  ;;  %v5794_v22 = vld [vmem:[%s8189_s7 + $0x4] ss:$16 sps:$4 sm:$0xff]  }
 0x104   :  { %2033 = vmatprep.subr.bf16.mxu0 %v5692_v43  ;;  %v5699_v43 = vld [vmem:[%s8186_s3 + $0x110] ss:$8 sps:$4 sm:$0xff]  }
 0x107   :  { %2034 = vmatpush1.bf16.msra.mxu0 %v5690_v44  ;;  %v5704_v44 = vld [vmem:[%s8186_s3 + $0x124] ss:$8 sps:$4 sm:$0xff]  }
 0x108   :  { %2035 = vmatprep.subr.bf16.mxu0 %v5695_v45  ;;  %v5702_v45 = vld [vmem:[%s8186_s3 + $0x120] ss:$8 sps:$4 sm:$0xff]  }
 0x10b   :  { %2036 = vmatpush1.bf16.msra.mxu0 %v5693_v46  ;;  %v5707_v46 = vld [vmem:[%s8186_s3 + $0x134] ss:$8 sps:$4 sm:$0xff]  }
 0x10c   :  { %2046 = vmatprep.subr.bf16.mxu0 %v5698_v47  ;;  %v5705_v47 = vld [vmem:[%s8186_s3 + $0x130] ss:$8 sps:$4 sm:$0xff]  }
 0x1a1   :  { %v1426_v20 = vpop.f32.mrb[0].mxu0  ;;  %v7113_v21 = vpop.f32.mrb[0].mxu1 }
 0x1a2   :  { %v5294_v23 = vadd.f32 %v1426_v20, %v244_v16  ;;  %v1428_v24 = vpop.f32.mrb[1].mxu0  ;;  %v1592_v25 = vpop.f32.mrb[1].mxu1  ;;  %v5296_v6 = vadd.f32 %v7113_v21, %v252_v3  ;;  %v5791_v20 = vld [vmem:[%s8187_s5 + $0xf4] ss:$8 sps:$4 sm:$0xff]   ;;  %v5789_v21 = vld [vmem:[%s8187_s5 + $0xf0] ss:$8 sps:$4 sm:$0xff]  }
 0x1a3   :  { %v5295_v26 = vadd.f32 %v1428_v24, %v248_v18  ;;  %v5297_v27 = vadd.f32 %v1592_v25, %v256_v19  ;;  %v1430_v28 = vpop.f32.mrb[2].mxu0  ;;  %v1594_v29 = vpop.f32.mrb[2].mxu1  ;;  %v5788_v18 = vld [vmem:[%s8187_s5 + $0xe4] ss:$8 sps:$4 sm:$0xff]   ;;  %v5786_v19 = vld [vmem:[%s8187_s5 + $0xe0] ss:$8 sps:$4 sm:$0xff]  }
 0x1a4   :  { %v1597_v30 = vmul.f32 0.01, %v5294_v23  ;;  %v1431_v31 = vpop.f32.mrb[3].mxu0  ;;  %v1595_v32 = vpop.f32.mrb[3].mxu1  ;;  %v1599_v11 = vmul.f32 0.01, %v5296_v6  ;;  %2325 = vmatprep.subr.bf16.mxu1 %v5788_v18 }
 0x1a5   :  { %v1598_v33 = vmul.f32 0.01, %v5295_v26  ;;  %v1600_v34 = vmul.f32 0.01, %v5297_v27  ;;  %2326 = vmatpush1.bf16.msra.mxu1 %v5786_v19  ;;  %v5797_v24 = vld [vmem:[%s8189_s7 + $0xc] ss:$16 sps:$4 sm:$0xff]  }
 0x1a6   :  { %v1601_v35 = vmax.f32 %v5294_v23, %v1597_v30  ;;  %v1603_v16 = vmax.f32 %v5296_v6, %v1599_v11  ;;  %2327 = vmatprep.subr.bf16.mxu1 %v5791_v20  ;;  %v5795_v23 = vld [vmem:[%s8189_s7 + $0x8] ss:$16 sps:$4 sm:$0xff]   ;;  %v5815_v29 = vld [vmem:[%s8189_s7 + $0x6c] ss:$16 sps:$4 sm:$0xff]   ;;  %v5806_v6 = vld [vmem:[%s8189_s7 + $0x44] ss:$16 sps:$4 sm:$0xff]  }
 0x1a7   :  { %v1602_v36 = vmax.f32 %v5295_v26, %v1598_v33  ;;  %v1604_v37 = vmax.f32 %v5297_v27, %v1600_v34  ;;  %v5801_v25 = vld [vmem:[%s8189_s7 + $0x28] ss:$16 sps:$4 sm:$0xff]   ;;  %v5803_v26 = vld [vmem:[%s8189_s7 + $0x2c] ss:$16 sps:$4 sm:$0xff]   ;;  %v5810_v11 = vld [vmem:[%s8189_s7 + $0x60] ss:$16 sps:$4 sm:$0xff]  }
 0x1a8   :  { %v1605_v40 = vpack.c.bf16 %v1601_v35, %v1601_v35  ;;  %v1607_v17 = vpack.c.bf16 %v1603_v16, %v1603_v16  ;;  %v5809_v27 = vld [vmem:[%s8189_s7 + $0x4c] ss:$16 sps:$4 sm:$0xff]   ;;  %v5807_v28 = vld [vmem:[%s8189_s7 + $0x48] ss:$16 sps:$4 sm:$0xff]   ;;  %v5824_v16 = vld [vmem:[%s8189_s7 + $0xa4] ss:$16 sps:$4 sm:$0xff]  }
 0x1a9   :  { %v1606_v38 = vpack.c.bf16 %v1602_v36, %v1602_v36  ;;  %v1608_v42 = vpack.c.bf16 %v1604_v37, %v1604_v37  ;;  %2328 = vmatpush1.bf16.msra.mxu1 %v5789_v21  ;;  %v5813_v30 = vld [vmem:[%s8189_s7 + $0x68] ss:$16 sps:$4 sm:$0xff]   ;;  %v5821_v31 = vld [vmem:[%s8189_s7 + $0x8c] ss:$16 sps:$4 sm:$0xff]   ;;  %v5830_v18 = vld [vmem:[%s8189_s7 + $0xc4] ss:$16 sps:$4 sm:$0xff]  }
 0x1aa   :  { %2750 = vmatprep.subr.bf16.mxu1 %v5794_v22  ;;  %v5819_v32 = vld [vmem:[%s8189_s7 + $0x88] ss:$16 sps:$4 sm:$0xff]   ;;  %v5827_v33 = vld [vmem:[%s8189_s7 + $0xac] ss:$16 sps:$4 sm:$0xff]   ;;  %v5828_v19 = vld [vmem:[%s8189_s7 + $0xc0] ss:$16 sps:$4 sm:$0xff]  }
 0x1ab   :  { %2037 = vmatprep.mubr.bf16.mxu0 %v1606_v38  ;;  %v5825_v34 = vld [vmem:[%s8189_s7 + $0xa8] ss:$16 sps:$4 sm:$0xff]   ;;  %v5833_v35 = vld [vmem:[%s8189_s7 + $0xcc] ss:$16 sps:$4 sm:$0xff]   ;;  %v5836_v20 = vld [vmem:[%s8189_s7 + $0xe4] ss:$16 sps:$4 sm:$0xff]  }
 0x1ac   :  { %2038 = vmatmul.mubr.bf16.vlgmr.msra.gmra.mrb[4].mxu0 %v1605_v40  ;;  %v5831_v36 = vld [vmem:[%s8189_s7 + $0xc8] ss:$16 sps:$4 sm:$0xff]   ;;  %v5839_v37 = vld [vmem:[%s8189_s7 + $0xec] ss:$16 sps:$4 sm:$0xff]   ;;  %v5834_v21 = vld [vmem:[%s8189_s7 + $0xe0] ss:$16 sps:$4 sm:$0xff]  }
 0x1ad   :  { %2047 = vmatpush1.bf16.msra.mxu0 %v5696_v39  ;;  %2078 = vmatprep.mubr.bf16.mxu0 %v1608_v42  ;;  %v5837_v38 = vld [vmem:[%s8189_s7 + $0xe8] ss:$16 sps:$4 sm:$0xff]   ;;  %v5845_v39 = vld [vmem:[%s8189_s7 + $0x10c] ss:$16 sps:$4 sm:$0xff]   ;;  %v5842_v22 = vld [vmem:[%s8189_s7 + $0x104] ss:$16 sps:$4 sm:$0xff]  }
 0x1ae   :  { %2048 = vmatprep.subr.bf16.mxu0 %v5701_v41  ;;  %v5843_v40 = vld [vmem:[%s8189_s7 + $0x108] ss:$16 sps:$4 sm:$0xff]   ;;  %v5851_v41 = vld [vmem:[%s8189_s7 + $0x12c] ss:$16 sps:$4 sm:$0xff]  }
 0x1af   :  { %v5849_v42 = vld [vmem:[%s8189_s7 + $0x128] ss:$16 sps:$4 sm:$0xff]  }
 0x1b1   :  { %2049 = vmatpush1.bf16.msra.mxu0 %v5699_v43  ;;  %v5857_v43 = vld [vmem:[%s8189_s7 + $0x14c] ss:$16 sps:$4 sm:$0xff]  }
 0x1b2   :  { %2050 = vmatprep.subr.bf16.mxu0 %v5704_v44  ;;  %v5855_v44 = vld [vmem:[%s8189_s7 + $0x148] ss:$16 sps:$4 sm:$0xff]  }
 0x1b5   :  { %2051 = vmatpush1.bf16.msra.mxu0 %v5702_v45  ;;  %v5863_v45 = vld [vmem:[%s8189_s7 + $0x16c] ss:$16 sps:$4 sm:$0xff]  }
 0x1b6   :  { %2052 = vmatprep.subr.bf16.mxu0 %v5707_v46  ;;  %v5861_v46 = vld [vmem:[%s8189_s7 + $0x168] ss:$16 sps:$4 sm:$0xff]  }
 0x1b9   :  { %2053 = vmatpush1.bf16.msra.mxu0 %v5705_v47  ;;  %v5869_v47 = vld [vmem:[%s8189_s7 + $0x18c] ss:$16 sps:$4 sm:$0xff]  }
 0x1ba   :  { %2054 = vmatprep.subr.bf16.mxu0 %v5710_v48  ;;  %v5867_v48 = vld [vmem:[%s8189_s7 + $0x188] ss:$16 sps:$4 sm:$0xff]  }
 0x1bd   :  { %2055 = vmatpush1.bf16.msra.mxu0 %v5708_v49  ;;  %v5875_v49 = vld [vmem:[%s8189_s7 + $0x1ac] ss:$16 sps:$4 sm:$0xff]  }
 0x1be   :  { %2056 = vmatprep.subr.bf16.mxu0 %v5713_v50  ;;  %v5873_v50 = vld [vmem:[%s8189_s7 + $0x1a8] ss:$16 sps:$4 sm:$0xff]  }
 0x1c1   :  { %2057 = vmatpush1.bf16.msra.mxu0 %v5711_v51  ;;  %v1673_v51 = vld [vmem:[%s8190_s4] sm:$0x3] }
 0x1c2   :  { %2058 = vmatprep.subr.bf16.mxu0 %v5716_v52  ;;  %v1678_v52 = vrot.slane %v1673_v51, %v7085_v10 }
 0x1c5   :  { %2059 = vmatpush1.bf16.msra.mxu0 %v5714_v53  ;;  %v1682_v53 = vrot.slane %v1673_v51, %v7096_v14 }
 0x1c6   :  { %2060 = vmatprep.subr.bf16.mxu0 %v5719_v54 }
 0x1c9   :  { %2061 = vmatpush1.bf16.msra.mxu0 %v5717_v55 }
 0x1ca   :  { %2062 = vmatprep.subr.bf16.mxu0 %v5722_v56 }
 0x1cd   :  { %2063 = vmatpush1.bf16.msra.mxu0 %v5720_v57 }
 0x1ce   :  { %2064 = vmatprep.subr.bf16.mxu0 %v5725_v58 }
 0x1d1   :  { %2065 = vmatpush1.bf16.msra.mxu0 %v5723_v59 }
 0x1d2   :  { %2066 = vmatprep.subr.bf16.mxu0 %v5728_v60 }
 0x1d5   :  { %2067 = vmatpush1.bf16.msra.mxu0 %v5726_v61 }
 0x1d6   :  { %2068 = vmatprep.subr.bf16.mxu0 %v5731_v62 }
 0x1d9   :  { %2069 = vmatpush1.bf16.msra.mxu0 %v5729_v63 }
 0x1da   :  { %2070 = vmatprep.subr.bf16.mxu0 %v5734_v1 }
 0x1dd   :  { %2071 = vmatpush1.bf16.msra.mxu0 %v5732_v2  ;;  %v5792_v2 = vld [vmem:[%s8189_s7] ss:$16 sps:$4 sm:$0xff]  }
 0x1de   :  { %2072 = vmatprep.subr.bf16.mxu0 %v5737_v4  ;;  %v5800_v4 = vld [vmem:[%s8189_s7 + $0x24] ss:$16 sps:$4 sm:$0xff]  }
 0x1e1   :  { %2073 = vmatpush1.bf16.msra.mxu0 %v5735_v5  ;;  %v5798_v5 = vld [vmem:[%s8189_s7 + $0x20] ss:$16 sps:$4 sm:$0xff]  }
 0x1e2   :  { %2074 = vmatprep.subr.bf16.mxu0 %v5740_v8  ;;  %v5804_v8 = vld [vmem:[%s8189_s7 + $0x40] ss:$16 sps:$4 sm:$0xff]  }
 0x1e5   :  { %2075 = vmatpush1.bf16.msra.mxu0 %v5738_v9  ;;  %v5812_v9 = vld [vmem:[%s8189_s7 + $0x64] ss:$16 sps:$4 sm:$0xff]  }
 0x1e6   :  { %2076 = vmatprep.subr.bf16.mxu0 %v5743_v13  ;;  %v5818_v13 = vld [vmem:[%s8189_s7 + $0x84] ss:$16 sps:$4 sm:$0xff]  }
 0x1e9   :  { %2077 = vmatpush1.bf16.msra.mxu0 %v5741_v15  ;;  %v5816_v15 = vld [vmem:[%s8189_s7 + $0x80] ss:$16 sps:$4 sm:$0xff]  }
 0x1ea   :  { %2791 = vmatprep.subr.bf16.mxu0 %v5797_v24  ;;  %v5848_v24 = vld [vmem:[%s8189_s7 + $0x124] ss:$16 sps:$4 sm:$0xff]  }
 0x1ec   :  { %2079 = vmatmul.mubr.bf16.vlgmr.msra.gmra.mrb[4].mxu0 %v1607_v17  ;;  %v5822_v17 = vld [vmem:[%s8189_s7 + $0xa0] ss:$16 sps:$4 sm:$0xff]  }
 0x1ed   :  { %2792 = vmatpush1.bf16.msra.mxu0 %v5795_v23  ;;  %v5840_v23 = vld [vmem:[%s8189_s7 + $0x100] ss:$16 sps:$4 sm:$0xff]  }
 0x1ee   :  { %2793 = vmatprep.subr.bf16.mxu0 %v5803_v26  ;;  %v5854_v26 = vld [vmem:[%s8189_s7 + $0x144] ss:$16 sps:$4 sm:$0xff]  }
 0x1f1   :  { %2794 = vmatpush1.bf16.msra.mxu0 %v5801_v25  ;;  %v5846_v25 = vld [vmem:[%s8189_s7 + $0x120] ss:$16 sps:$4 sm:$0xff]  }
 0x1f2   :  { %2795 = vmatprep.subr.bf16.mxu0 %v5809_v27  ;;  %v5852_v27 = vld [vmem:[%s8189_s7 + $0x140] ss:$16 sps:$4 sm:$0xff]  }
 0x1f5   :  { %2796 = vmatpush1.bf16.msra.mxu0 %v5807_v28  ;;  %v5860_v28 = vld [vmem:[%s8189_s7 + $0x164] ss:$16 sps:$4 sm:$0xff]  }
 0x1f6   :  { %2797 = vmatprep.subr.bf16.mxu0 %v5815_v29  ;;  %v5858_v29 = vld [vmem:[%s8189_s7 + $0x160] ss:$16 sps:$4 sm:$0xff]  }
 0x1f9   :  { %2798 = vmatpush1.bf16.msra.mxu0 %v5813_v30  ;;  %v5866_v30 = vld [vmem:[%s8189_s7 + $0x184] ss:$16 sps:$4 sm:$0xff]  }
 0x1fa   :  { %2799 = vmatprep.subr.bf16.mxu0 %v5821_v31  ;;  %v5864_v31 = vld [vmem:[%s8189_s7 + $0x180] ss:$16 sps:$4 sm:$0xff]  }
 0x1fd   :  { %2800 = vmatpush1.bf16.msra.mxu0 %v5819_v32  ;;  %v5872_v32 = vld [vmem:[%s8189_s7 + $0x1a4] ss:$16 sps:$4 sm:$0xff]  }
 0x1fe   :  { %2801 = vmatprep.subr.bf16.mxu0 %v5827_v33  ;;  %v5870_v33 = vld [vmem:[%s8189_s7 + $0x1a0] ss:$16 sps:$4 sm:$0xff]  }
 0x201   :  { %2802 = vmatpush1.bf16.msra.mxu0 %v5825_v34  ;;  %v5878_v34 = vld [vmem:[%s8189_s7 + $0x1c4] ss:$16 sps:$4 sm:$0xff]  }
 0x202   :  { %2803 = vmatprep.subr.bf16.mxu0 %v5833_v35  ;;  %v5881_v35 = vld [vmem:[%s8189_s7 + $0x1cc] ss:$16 sps:$4 sm:$0xff]  }
 0x205   :  { %2804 = vmatpush1.bf16.msra.mxu0 %v5831_v36  ;;  %v5876_v36 = vld [vmem:[%s8189_s7 + $0x1c0] ss:$16 sps:$4 sm:$0xff]  }
 0x206   :  { %2805 = vmatprep.subr.bf16.mxu0 %v5839_v37  ;;  %v5879_v37 = vld [vmem:[%s8189_s7 + $0x1c8] ss:$16 sps:$4 sm:$0xff]  }
 0x209   :  { %2806 = vmatpush1.bf16.msra.mxu0 %v5837_v38  ;;  %v5884_v38 = vld [vmem:[%s8189_s7 + $0x1e4] ss:$16 sps:$4 sm:$0xff]  }
 0x20a   :  { %2807 = vmatprep.subr.bf16.mxu0 %v5845_v39  ;;  %v5887_v39 = vld [vmem:[%s8189_s7 + $0x1ec] ss:$16 sps:$4 sm:$0xff]  }
 0x20d   :  { %2808 = vmatpush1.bf16.msra.mxu0 %v5843_v40  ;;  %v5882_v40 = vld [vmem:[%s8189_s7 + $0x1e0] ss:$16 sps:$4 sm:$0xff]  }
 0x20e   :  { %2809 = vmatprep.subr.bf16.mxu0 %v5851_v41  ;;  %v5885_v41 = vld [vmem:[%s8189_s7 + $0x1e8] ss:$16 sps:$4 sm:$0xff]  }
 0x211   :  { %2810 = vmatpush1.bf16.msra.mxu0 %v5849_v42  ;;  %v5890_v42 = vld [vmem:[%s8191_s9 + $0x4] ss:$28 sps:$4 sm:$0xff]  }
 0x212   :  { %2811 = vmatprep.subr.bf16.mxu0 %v5857_v43  ;;  %v5893_v43 = vld [vmem:[%s8191_s9 + $0xc] ss:$28 sps:$4 sm:$0xff]  }
 0x215   :  { %2812 = vmatpush1.bf16.msra.mxu0 %v5855_v44  ;;  %v2125_v44 = vld [vmem:[%s8192_s6] sm:$0x3] }
 0x216   :  { %2813 = vmatprep.subr.bf16.mxu0 %v5863_v45  ;;  %v2130_v45 = vrot.slane %v2125_v44, %v7085_v10 }
 0x219   :  { %2814 = vmatpush1.bf16.msra.mxu0 %v5861_v46  ;;  %v2134_v46 = vrot.slane %v2125_v44, %v7096_v14  ;;  %v5954_v44 = vld [vmem:[%s8191_s9 + $0x268] ss:$28 sps:$4 sm:$0xff]  }
 0x21a   :  { %2815 = vmatprep.subr.bf16.mxu0 %v5869_v47 }
 0x21d   :  { %2816 = vmatpush1.bf16.msra.mxu0 %v5867_v48 }
 0x21e   :  { %2817 = vmatprep.subr.bf16.mxu0 %v5875_v49 }
 0x221   :  { %2818 = vmatpush1.bf16.msra.mxu0 %v5873_v50 }
 0x222   :  { %2819 = vmatprep.subr.bf16.mxu0 %v5881_v35  ;;  %v5947_v35 = vld [vmem:[%s8191_s9 + $0x204] ss:$28 sps:$4 sm:$0xff]  }
 0x225   :  { %2820 = vmatpush1.bf16.msra.mxu0 %v5879_v37  ;;  %v5945_v37 = vld [vmem:[%s8191_s9 + $0x200] ss:$28 sps:$4 sm:$0xff]  }
 0x226   :  { %2821 = vmatprep.subr.bf16.mxu0 %v5887_v39  ;;  %v5953_v39 = vld [vmem:[%s8191_s9 + $0x23c] ss:$28 sps:$4 sm:$0xff]  }
 0x229   :  { %2822 = vmatpush1.bf16.msra.mxu0 %v5885_v41  ;;  %v5951_v41 = vld [vmem:[%s8191_s9 + $0x238] ss:$28 sps:$4 sm:$0xff]  }
 0x22a   :  { %4371 = vmatprep.subr.bf16.mxu0 %v5893_v43  ;;  %v5959_v43 = vld [vmem:[%s8191_s9 + $0x274] ss:$28 sps:$4 sm:$0xff]  }
 0x2bf   :  { %v2080_v54 = vpop.f32.mrb[4].mxu0 }
 0x2c0   :  { %v5298_v55 = vadd.f32 %v2080_v54, %v1678_v52  ;;  %v2082_v56 = vpop.f32.mrb[5].mxu0 }
 0x2c1   :  { %v5299_v57 = vadd.f32 %v2082_v56, %v1682_v53  ;;  %v2084_v58 = vpop.f32.mrb[6].mxu0 }
 0x2c2   :  { %v2087_v59 = vmul.f32 0.01, %v5298_v55  ;;  %v2085_v60 = vpop.f32.mrb[7].mxu0  ;;  %v5888_v58 = vld [vmem:[%s8191_s9] ss:$28 sps:$4 sm:$0xff]  }
 0x2c3   :  { %v2088_v61 = vmul.f32 0.01, %v5299_v57 }
 0x2c4   :  { %v2089_v62 = vmax.f32 %v5298_v55, %v2087_v59  ;;  %v5891_v59 = vld [vmem:[%s8191_s9 + $0x8] ss:$28 sps:$4 sm:$0xff]  }
 0x2c5   :  { %v2090_v63 = vmax.f32 %v5299_v57, %v2088_v61  ;;  %v5896_v61 = vld [vmem:[%s8191_s9 + $0x3c] ss:$28 sps:$4 sm:$0xff]  }
 0x2c6   :  { %v2091_v3 = vpack.c.bf16 %v2089_v62, %v2089_v62  ;;  %v5899_v62 = vld [vmem:[%s8191_s9 + $0x44] ss:$28 sps:$4 sm:$0xff]  }
 0x2c7   :  { %v2092_v1 = vpack.c.bf16 %v2090_v63, %v2090_v63  ;;  %v5894_v63 = vld [vmem:[%s8191_s9 + $0x38] ss:$28 sps:$4 sm:$0xff]  }
 0x2c9   :  { %2329 = vmatprep.mubr.bf16.mxu1 %v2092_v1  ;;  %v5897_v1 = vld [vmem:[%s8191_s9 + $0x40] ss:$28 sps:$4 sm:$0xff]  }
 0x2ca   :  { %2330 = vmatmul.mubr.bf16.vlgmr.msra.gmra.mrb[4].mxu1 %v2091_v3  ;;  %v5905_v3 = vld [vmem:[%s8191_s9 + $0x7c] ss:$28 sps:$4 sm:$0xff]  }
 0x2cb   :  { %2751 = vmatpush1.bf16.msra.mxu1 %v5792_v2  ;;  %v5902_v2 = vld [vmem:[%s8191_s9 + $0x74] ss:$28 sps:$4 sm:$0xff]  }
 0x2cc   :  { %2752 = vmatprep.subr.bf16.mxu1 %v5800_v4  ;;  %v5900_v4 = vld [vmem:[%s8191_s9 + $0x70] ss:$28 sps:$4 sm:$0xff]  }
 0x2cf   :  { %2753 = vmatpush1.bf16.msra.mxu1 %v5798_v5  ;;  %v5903_v5 = vld [vmem:[%s8191_s9 + $0x78] ss:$28 sps:$4 sm:$0xff]  }
 0x2d0   :  { %2754 = vmatprep.subr.bf16.mxu1 %v5806_v6  ;;  %v5908_v6 = vld [vmem:[%s8191_s9 + $0xac] ss:$28 sps:$4 sm:$0xff]  }
 0x2d3   :  { %2755 = vmatpush1.bf16.msra.mxu1 %v5804_v8  ;;  %v5911_v8 = vld [vmem:[%s8191_s9 + $0xb4] ss:$28 sps:$4 sm:$0xff]  }
 0x2d4   :  { %2756 = vmatprep.subr.bf16.mxu1 %v5812_v9  ;;  %v5906_v9 = vld [vmem:[%s8191_s9 + $0xa8] ss:$28 sps:$4 sm:$0xff]  }
 0x2d7   :  { %2757 = vmatpush1.bf16.msra.mxu1 %v5810_v11  ;;  %v5909_v11 = vld [vmem:[%s8191_s9 + $0xb0] ss:$28 sps:$4 sm:$0xff]  }
 0x2d8   :  { %2758 = vmatprep.subr.bf16.mxu1 %v5818_v13  ;;  %v5914_v13 = vld [vmem:[%s8191_s9 + $0xe4] ss:$28 sps:$4 sm:$0xff]  }
 0x2db   :  { %2759 = vmatpush1.bf16.msra.mxu1 %v5816_v15  ;;  %v5917_v15 = vld [vmem:[%s8191_s9 + $0xec] ss:$28 sps:$4 sm:$0xff]  }
 0x2dc   :  { %2760 = vmatprep.subr.bf16.mxu1 %v5824_v16  ;;  %v5912_v16 = vld [vmem:[%s8191_s9 + $0xe0] ss:$28 sps:$4 sm:$0xff]  }
 0x2df   :  { %2761 = vmatpush1.bf16.msra.mxu1 %v5822_v17  ;;  %v5915_v17 = vld [vmem:[%s8191_s9 + $0xe8] ss:$28 sps:$4 sm:$0xff]  }
 0x2e0   :  { %2762 = vmatprep.subr.bf16.mxu1 %v5830_v18  ;;  %v5920_v18 = vld [vmem:[%s8191_s9 + $0x11c] ss:$28 sps:$4 sm:$0xff]  }
 0x2e3   :  { %2763 = vmatpush1.bf16.msra.mxu1 %v5828_v19  ;;  %v5923_v19 = vld [vmem:[%s8191_s9 + $0x124] ss:$28 sps:$4 sm:$0xff]  }
 0x2e4   :  { %2764 = vmatprep.subr.bf16.mxu1 %v5836_v20  ;;  %v5918_v20 = vld [vmem:[%s8191_s9 + $0x118] ss:$28 sps:$4 sm:$0xff]  }
 0x2e7   :  { %2765 = vmatpush1.bf16.msra.mxu1 %v5834_v21  ;;  %v5921_v21 = vld [vmem:[%s8191_s9 + $0x120] ss:$28 sps:$4 sm:$0xff]  }
 0x2e8   :  { %2766 = vmatprep.subr.bf16.mxu1 %v5842_v22  ;;  %v5926_v22 = vld [vmem:[%s8191_s9 + $0x154] ss:$28 sps:$4 sm:$0xff]  }
 0x2eb   :  { %2767 = vmatpush1.bf16.msra.mxu1 %v5840_v23  ;;  %v5929_v23 = vld [vmem:[%s8191_s9 + $0x15c] ss:$28 sps:$4 sm:$0xff]  }
 0x2ec   :  { %2768 = vmatprep.subr.bf16.mxu1 %v5848_v24  ;;  %v5924_v24 = vld [vmem:[%s8191_s9 + $0x150] ss:$28 sps:$4 sm:$0xff]  }
 0x2ef   :  { %2769 = vmatpush1.bf16.msra.mxu1 %v5846_v25  ;;  %v5927_v25 = vld [vmem:[%s8191_s9 + $0x158] ss:$28 sps:$4 sm:$0xff]  }
 0x2f0   :  { %2770 = vmatprep.subr.bf16.mxu1 %v5854_v26  ;;  %v5932_v26 = vld [vmem:[%s8191_s9 + $0x18c] ss:$28 sps:$4 sm:$0xff]  }
 0x2f3   :  { %2771 = vmatpush1.bf16.msra.mxu1 %v5852_v27  ;;  %v5935_v27 = vld [vmem:[%s8191_s9 + $0x194] ss:$28 sps:$4 sm:$0xff]  }
 0x2f4   :  { %2772 = vmatprep.subr.bf16.mxu1 %v5860_v28  ;;  %v5930_v28 = vld [vmem:[%s8191_s9 + $0x188] ss:$28 sps:$4 sm:$0xff]  }
 0x2f7   :  { %2773 = vmatpush1.bf16.msra.mxu1 %v5858_v29  ;;  %v5933_v29 = vld [vmem:[%s8191_s9 + $0x190] ss:$28 sps:$4 sm:$0xff]  }
 0x2f8   :  { %2774 = vmatprep.subr.bf16.mxu1 %v5866_v30  ;;  %v5938_v30 = vld [vmem:[%s8191_s9 + $0x1c4] ss:$28 sps:$4 sm:$0xff]  }
 0x2fb   :  { %2775 = vmatpush1.bf16.msra.mxu1 %v5864_v31  ;;  %v5941_v31 = vld [vmem:[%s8191_s9 + $0x1cc] ss:$28 sps:$4 sm:$0xff]  }
 0x2fc   :  { %2776 = vmatprep.subr.bf16.mxu1 %v5872_v32  ;;  %v5936_v32 = vld [vmem:[%s8191_s9 + $0x1c0] ss:$28 sps:$4 sm:$0xff]  }
 0x2ff   :  { %2777 = vmatpush1.bf16.msra.mxu1 %v5870_v33  ;;  %v5939_v33 = vld [vmem:[%s8191_s9 + $0x1c8] ss:$28 sps:$4 sm:$0xff]  }
 0x300   :  { %2778 = vmatprep.subr.bf16.mxu1 %v5878_v34  ;;  %v5944_v34 = vld [vmem:[%s8191_s9 + $0x1fc] ss:$28 sps:$4 sm:$0xff]  }
 0x303   :  { %2779 = vmatpush1.bf16.msra.mxu1 %v5876_v36  ;;  %v5942_v36 = vld [vmem:[%s8191_s9 + $0x1f8] ss:$28 sps:$4 sm:$0xff]  }
 0x304   :  { %2780 = vmatprep.subr.bf16.mxu1 %v5884_v38  ;;  %v5950_v38 = vld [vmem:[%s8191_s9 + $0x234] ss:$28 sps:$4 sm:$0xff]  }
 0x307   :  { %2781 = vmatpush1.bf16.msra.mxu1 %v5882_v40  ;;  %v5948_v40 = vld [vmem:[%s8191_s9 + $0x230] ss:$28 sps:$4 sm:$0xff]  }
 0x308   :  { %4289 = vmatprep.subr.bf16.mxu1 %v5890_v42  ;;  %v5956_v42 = vld [vmem:[%s8191_s9 + $0x26c] ss:$28 sps:$4 sm:$0xff]  }
 0x39d   :  { %v2331_v47 = vpop.f32.mrb[4].mxu1 }
 0x39e   :  { %v2332_v48 = vadd.f32 %v2331_v47, %v2130_v45  ;;  %v2333_v49 = vpop.f32.mrb[5].mxu1  ;;  %v5957_v45 = vld [vmem:[%s8191_s9 + $0x270] ss:$28 sps:$4 sm:$0xff]  }
 0x39f   :  { %v2334_v50 = vadd.f32 %v2333_v49, %v2134_v46  ;;  %v2335_v51 = vpop.f32.mrb[6].mxu1  ;;  %v5962_v46 = vld [vmem:[%s8191_s9 + $0x2a4] ss:$28 sps:$4 sm:$0xff]   ;;  %v5965_v47 = vld [vmem:[%s8191_s9 + $0x2ac] ss:$28 sps:$4 sm:$0xff]  }
 0x3a0   :  { %v2338_v52 = vmul.f32 0.01, %v2332_v48  ;;  %v2336_v53 = vpop.f32.mrb[7].mxu1  ;;  %v5963_v49 = vld [vmem:[%s8191_s9 + $0x2a8] ss:$28 sps:$4 sm:$0xff]  }
 0x3a1   :  { %v2339_v54 = vmul.f32 0.01, %v2334_v50  ;;  %v5971_v51 = vld [vmem:[%s8191_s9 + $0x2e4] ss:$28 sps:$4 sm:$0xff]  }
 0x3a2   :  { %v2340_v55 = vmax.f32 %v2332_v48, %v2338_v52  ;;  %v5960_v48 = vld [vmem:[%s8191_s9 + $0x2a0] ss:$28 sps:$4 sm:$0xff]   ;;  %v5966_v52 = vld [vmem:[%s8191_s9 + $0x2d8] ss:$28 sps:$4 sm:$0xff]  }
 0x3a3   :  { %v2341_v56 = vmax.f32 %v2334_v50, %v2339_v54  ;;  %v5968_v50 = vld [vmem:[%s8191_s9 + $0x2dc] ss:$28 sps:$4 sm:$0xff]   ;;  %v5974_v54 = vld [vmem:[%s8191_s9 + $0x314] ss:$28 sps:$4 sm:$0xff]  }
 0x3a4   :  { %v2342_v60 = vpack.c.bf16 %v2340_v55, %v2340_v55  ;;  %v5969_v53 = vld [vmem:[%s8191_s9 + $0x2e0] ss:$28 sps:$4 sm:$0xff]  }
 0x3a5   :  { %v2343_v57 = vpack.c.bf16 %v2341_v56, %v2341_v56  ;;  %v5977_v55 = vld [vmem:[%s8191_s9 + $0x31c] ss:$28 sps:$4 sm:$0xff]   ;;  %v5972_v56 = vld [vmem:[%s8191_s9 + $0x310] ss:$28 sps:$4 sm:$0xff]  }
 0x3a7   :  { %2782 = vmatprep.mubr.bf16.mxu1 %v2343_v57  ;;  %2823 = vmatprep.mubr.bf16.mxu0 %v2343_v57  ;;  %v5975_v57 = vld [vmem:[%s8191_s9 + $0x318] ss:$28 sps:$4 sm:$0xff]  }
 0x3a8   :  { %2783 = vmatmul.mubr.bf16.vlgmr.msra.gmra.mrb[8].mxu1 %v2342_v60  ;;  %2824 = vmatmul.mubr.bf16.vlgmr.msra.gmra.mrb[8].mxu0 %v2342_v60  ;;  %v5978_v60 = vld [vmem:[%s8191_s9 + $0x348] ss:$28 sps:$4 sm:$0xff]  }
 0x3a9   :  { %4290 = vmatpush1.bf16.msra.mxu1 %v5888_v58  ;;  %4372 = vmatpush1.bf16.msra.mxu0 %v5891_v59  ;;  %v5980_v58 = vld [vmem:[%s8191_s9 + $0x34c] ss:$28 sps:$4 sm:$0xff]   ;;  %v5983_v59 = vld [vmem:[%s8191_s9 + $0x354] ss:$28 sps:$4 sm:$0xff]  }
 0x3aa   :  { %4291 = vmatprep.subr.bf16.mxu1 %v5896_v61  ;;  %4373 = vmatprep.subr.bf16.mxu0 %v5899_v62  ;;  %v5981_v61 = vld [vmem:[%s8191_s9 + $0x350] ss:$28 sps:$4 sm:$0xff]   ;;  %v5986_v62 = vld [vmem:[%s8191_s9 + $0x384] ss:$28 sps:$4 sm:$0xff]  }
 0x3ad   :  { %4292 = vmatpush1.bf16.msra.mxu1 %v5894_v63  ;;  %4374 = vmatpush1.bf16.msra.mxu0 %v5897_v1  ;;  %v5989_v63 = vld [vmem:[%s8191_s9 + $0x38c] ss:$28 sps:$4 sm:$0xff]   ;;  %v7632_v1 = vld [vmem:[%s8193_s8] sm:$0xf] }
 0x3ae   :  { %4293 = vmatprep.subr.bf16.mxu1 %v5902_v2  ;;  %4375 = vmatprep.subr.bf16.mxu0 %v5905_v3  ;;  %v2413_v2 = vrot.slane %v7632_v1, %v7085_v10  ;;  %v2417_v3 = vrot.slane %v7632_v1, %v7096_v14 }
 0x3b1   :  { %4294 = vmatpush1.bf16.msra.mxu1 %v5900_v4  ;;  %4376 = vmatpush1.bf16.msra.mxu0 %v5903_v5  ;;  %v2425_v4 = vrot.slane %v7632_v1, %v7099_v12 }
 0x3b2   :  { %4295 = vmatprep.subr.bf16.mxu1 %v5908_v6  ;;  %4377 = vmatprep.subr.bf16.mxu0 %v5911_v8 }
 0x3b5   :  { %4296 = vmatpush1.bf16.msra.mxu1 %v5906_v9  ;;  %4378 = vmatpush1.bf16.msra.mxu0 %v5909_v11 }
 0x3b6   :  { %4297 = vmatprep.subr.bf16.mxu1 %v5914_v13  ;;  %4379 = vmatprep.subr.bf16.mxu0 %v5917_v15 }
 0x3b9   :  { %4298 = vmatpush1.bf16.msra.mxu1 %v5912_v16  ;;  %4380 = vmatpush1.bf16.msra.mxu0 %v5915_v17 }
 0x3ba   :  { %4299 = vmatprep.subr.bf16.mxu1 %v5920_v18  ;;  %4381 = vmatprep.subr.bf16.mxu0 %v5923_v19 }
 0x3bd   :  { %4300 = vmatpush1.bf16.msra.mxu1 %v5918_v20  ;;  %4382 = vmatpush1.bf16.msra.mxu0 %v5921_v21 }
 0x3be   :  { %4301 = vmatprep.subr.bf16.mxu1 %v5926_v22  ;;  %4383 = vmatprep.subr.bf16.mxu0 %v5929_v23 }
 0x3c1   :  { %4302 = vmatpush1.bf16.msra.mxu1 %v5924_v24  ;;  %4384 = vmatpush1.bf16.msra.mxu0 %v5927_v25 }
 0x3c2   :  { %4303 = vmatprep.subr.bf16.mxu1 %v5932_v26  ;;  %4385 = vmatprep.subr.bf16.mxu0 %v5935_v27  ;;  %v5984_v27 = vld [vmem:[%s8191_s9 + $0x380] ss:$28 sps:$4 sm:$0xff]  }
 0x3c5   :  { %4304 = vmatpush1.bf16.msra.mxu1 %v5930_v28  ;;  %4386 = vmatpush1.bf16.msra.mxu0 %v5933_v29  ;;  %v5987_v28 = vld [vmem:[%s8191_s9 + $0x388] ss:$28 sps:$4 sm:$0xff]  }
 0x3c6   :  { %4305 = vmatprep.subr.bf16.mxu1 %v5938_v30  ;;  %4387 = vmatprep.subr.bf16.mxu0 %v5941_v31  ;;  %v5992_v30 = vld [vmem:[%s8191_s9 + $0x3bc] ss:$28 sps:$4 sm:$0xff]   ;;  %v5995_v31 = vld [vmem:[%s8191_s9 + $0x3c4] ss:$28 sps:$4 sm:$0xff]  }
 0x3c9   :  { %4306 = vmatpush1.bf16.msra.mxu1 %v5936_v32  ;;  %4388 = vmatpush1.bf16.msra.mxu0 %v5939_v33  ;;  %v5990_v33 = vld [vmem:[%s8191_s9 + $0x3b8] ss:$28 sps:$4 sm:$0xff]  }
 0x3ca   :  { %4307 = vmatprep.subr.bf16.mxu1 %v5944_v34  ;;  %4389 = vmatprep.subr.bf16.mxu0 %v5947_v35  ;;  %v5993_v34 = vld [vmem:[%s8191_s9 + $0x3c0] ss:$28 sps:$4 sm:$0xff]   ;;  %v5998_v35 = vld [vmem:[%s8191_s9 + $0x3f4] ss:$28 sps:$4 sm:$0xff]  }
 0x3cd   :  { %4308 = vmatpush1.bf16.msra.mxu1 %v5942_v36  ;;  %4390 = vmatpush1.bf16.msra.mxu0 %v5945_v37  ;;  %v6001_v36 = vld [vmem:[%s8191_s9 + $0x3fc] ss:$28 sps:$4 sm:$0xff]   ;;  %v5996_v37 = vld [vmem:[%s8191_s9 + $0x3f0] ss:$28 sps:$4 sm:$0xff]  }
 0x3ce   :  { %4309 = vmatprep.subr.bf16.mxu1 %v5950_v38  ;;  %4391 = vmatprep.subr.bf16.mxu0 %v5953_v39  ;;  %v5999_v38 = vld [vmem:[%s8191_s9 + $0x3f8] ss:$28 sps:$4 sm:$0xff]   ;;  %v6004_v39 = vld [vmem:[%s8191_s9 + $0x42c] ss:$28 sps:$4 sm:$0xff]  }
 0x3d1   :  { %4310 = vmatpush1.bf16.msra.mxu1 %v5948_v40  ;;  %4392 = vmatpush1.bf16.msra.mxu0 %v5951_v41  ;;  %v6007_v40 = vld [vmem:[%s8191_s9 + $0x434] ss:$28 sps:$4 sm:$0xff]   ;;  %v6002_v41 = vld [vmem:[%s8191_s9 + $0x428] ss:$28 sps:$4 sm:$0xff]  }
 0x3d2   :  { %4311 = vmatprep.subr.bf16.mxu1 %v5956_v42  ;;  %4393 = vmatprep.subr.bf16.mxu0 %v5959_v43  ;;  %v6005_v42 = vld [vmem:[%s8191_s9 + $0x430] ss:$28 sps:$4 sm:$0xff]   ;;  %v6010_v43 = vld [vmem:[%s8191_s9 + $0x464] ss:$28 sps:$4 sm:$0xff]  }
 0x3d5   :  { %4312 = vmatpush1.bf16.msra.mxu1 %v5954_v44  ;;  %4394 = vmatpush1.bf16.msra.mxu0 %v5957_v45  ;;  %v6013_v44 = vld [vmem:[%s8191_s9 + $0x46c] ss:$28 sps:$4 sm:$0xff]   ;;  %v6008_v45 = vld [vmem:[%s8191_s9 + $0x460] ss:$28 sps:$4 sm:$0xff]  }
 0x3d6   :  { %4313 = vmatprep.subr.bf16.mxu1 %v5962_v46  ;;  %4395 = vmatprep.subr.bf16.mxu0 %v5965_v47  ;;  %v6011_v46 = vld [vmem:[%s8191_s9 + $0x468] ss:$28 sps:$4 sm:$0xff]   ;;  %v6016_v47 = vld [vmem:[%s8191_s9 + $0x49c] ss:$28 sps:$4 sm:$0xff]  }
 0x3d9   :  { %4314 = vmatpush1.bf16.msra.mxu1 %v5960_v48  ;;  %4396 = vmatpush1.bf16.msra.mxu0 %v5963_v49  ;;  %v6019_v48 = vld [vmem:[%s8191_s9 + $0x4a4] ss:$28 sps:$4 sm:$0xff]   ;;  %v6014_v49 = vld [vmem:[%s8191_s9 + $0x498] ss:$28 sps:$4 sm:$0xff]  }
 0x3da   :  { %4315 = vmatprep.subr.bf16.mxu1 %v5968_v50  ;;  %4397 = vmatprep.subr.bf16.mxu0 %v5971_v51  ;;  %v6017_v50 = vld [vmem:[%s8191_s9 + $0x4a0] ss:$28 sps:$4 sm:$0xff]   ;;  %v6022_v51 = vld [vmem:[%s8191_s9 + $0x4d4] ss:$28 sps:$4 sm:$0xff]  }
 0x3dd   :  { %4316 = vmatpush1.bf16.msra.mxu1 %v5966_v52  ;;  %4398 = vmatpush1.bf16.msra.mxu0 %v5969_v53  ;;  %v6025_v52 = vld [vmem:[%s8191_s9 + $0x4dc] ss:$28 sps:$4 sm:$0xff]   ;;  %v6020_v53 = vld [vmem:[%s8191_s9 + $0x4d0] ss:$28 sps:$4 sm:$0xff]  }
 0x3de   :  { %4317 = vmatprep.subr.bf16.mxu1 %v5974_v54  ;;  %4399 = vmatprep.subr.bf16.mxu0 %v5977_v55  ;;  %v6023_v54 = vld [vmem:[%s8191_s9 + $0x4d8] ss:$28 sps:$4 sm:$0xff]   ;;  %v6028_v55 = vld [vmem:[%s8191_s9 + $0x50c] ss:$28 sps:$4 sm:$0xff]  }
 0x3e1   :  { %4318 = vmatpush1.bf16.msra.mxu1 %v5972_v56  ;;  %4400 = vmatpush1.bf16.msra.mxu0 %v5975_v57  ;;  %v6031_v56 = vld [vmem:[%s8191_s9 + $0x514] ss:$28 sps:$4 sm:$0xff]   ;;  %v6026_v57 = vld [vmem:[%s8191_s9 + $0x508] ss:$28 sps:$4 sm:$0xff]  }
 0x3e2   :  { %4319 = vmatprep.subr.bf16.mxu1 %v5980_v58  ;;  %4401 = vmatprep.subr.bf16.mxu0 %v5983_v59  ;;  %v6029_v58 = vld [vmem:[%s8191_s9 + $0x510] ss:$28 sps:$4 sm:$0xff]   ;;  %v6034_v59 = vld [vmem:[%s8191_s9 + $0x544] ss:$28 sps:$4 sm:$0xff]  }
 0x3e5   :  { %4320 = vmatpush1.bf16.msra.mxu1 %v5978_v60  ;;  %4402 = vmatpush1.bf16.msra.mxu0 %v5981_v61  ;;  %v6037_v60 = vld [vmem:[%s8191_s9 + $0x54c] ss:$28 sps:$4 sm:$0xff]   ;;  %v6032_v61 = vld [vmem:[%s8191_s9 + $0x540] ss:$28 sps:$4 sm:$0xff]  }
 0x3e6   :  { %4330 = vmatprep.subr.bf16.mxu1 %v5986_v62  ;;  %4412 = vmatprep.subr.bf16.mxu0 %v5989_v63  ;;  %v6035_v62 = vld [vmem:[%s8191_s9 + $0x548] ss:$28 sps:$4 sm:$0xff]   ;;  %v6040_v63 = vld [vmem:[%s8191_s9 + $0x57c] ss:$28 sps:$4 sm:$0xff]  }
 0x47b   :  { %v2784_v5 = vpop.f32.mrb[8].mxu1  ;;  %v7640_v6 = vpop.f32.mrb[8].mxu0 }
 0x47c   :  { %v2785_v8 = vadd.f32 %v2784_v5, %v2413_v2  ;;  %v2786_v9 = vpop.f32.mrb[9].mxu1  ;;  %v2827_v11 = vpop.f32.mrb[9].mxu0  ;;  %v6043_v2 = vld [vmem:[%s8191_s9 + $0x584] ss:$28 sps:$4 sm:$0xff]   ;;  %v6046_v5 = vld [vmem:[%s8191_s9 + $0x5b4] ss:$28 sps:$4 sm:$0xff]  }
 0x47d   :  { %v2787_v13 = vadd.f32 %v2786_v9, %v2417_v3  ;;  %v2828_v15 = vadd.f32 %v2827_v11, %v2425_v4  ;;  %v2788_v16 = vpop.f32.mrb[10].mxu1  ;;  %v2829_v17 = vpop.f32.mrb[10].mxu0  ;;  %v6038_v3 = vld [vmem:[%s8191_s9 + $0x578] ss:$28 sps:$4 sm:$0xff]   ;;  %v6041_v4 = vld [vmem:[%s8191_s9 + $0x580] ss:$28 sps:$4 sm:$0xff]  }
 0x47e   :  { %v2832_v18 = vmul.f32 0.01, %v2785_v8  ;;  %v2789_v19 = vpop.f32.mrb[11].mxu1  ;;  %v2830_v20 = vpop.f32.mrb[11].mxu0  ;;  %v6044_v9 = vld [vmem:[%s8191_s9 + $0x5b0] ss:$28 sps:$4 sm:$0xff]  }
 0x47f   :  { %v2833_v21 = vmul.f32 0.01, %v2787_v13  ;;  %v2835_v22 = vmul.f32 0.01, %v2828_v15  ;;  %v6047_v11 = vld [vmem:[%s8191_s9 + $0x5b8] ss:$28 sps:$4 sm:$0xff]  }
 0x480   :  { %v2836_v23 = vmax.f32 %v2785_v8, %v2832_v18  ;;  %v6049_v8 = vld [vmem:[%s8191_s9 + $0x5bc] ss:$28 sps:$4 sm:$0xff]   ;;  %v6050_v16 = vld [vmem:[%s8191_s9 + $0x5e8] ss:$28 sps:$4 sm:$0xff]   ;;  %v6053_v17 = vld [vmem:[%s8191_s9 + $0x5f0] ss:$28 sps:$4 sm:$0xff]  }
 0x481   :  { %v2837_v24 = vmax.f32 %v2787_v13, %v2833_v21  ;;  %v2839_v25 = vmax.f32 %v2828_v15, %v2835_v22  ;;  %v6052_v13 = vld [vmem:[%s8191_s9 + $0x5ec] ss:$28 sps:$4 sm:$0xff]   ;;  %v6055_v15 = vld [vmem:[%s8191_s9 + $0x5f4] ss:$28 sps:$4 sm:$0xff]   ;;  %v6058_v18 = vld [vmem:[%s8191_s9 + $0x624] ss:$28 sps:$4 sm:$0xff]   ;;  %v2421_v22 = vrot.slane %v7632_v1, %v7188_v0 }
 0x482   :  { %v7650_v29 = vpack.c.bf16 %v2836_v23, %v2836_v23  ;;  %v6061_v19 = vld [vmem:[%s8191_s9 + $0x62c] ss:$28 sps:$4 sm:$0xff]   ;;  %v6056_v20 = vld [vmem:[%s8191_s9 + $0x620] ss:$28 sps:$4 sm:$0xff]  }
 0x483   :  { %v7642_v26 = vpack.c.bf16 %v2837_v24, %v2837_v24  ;;  %v7660_v32 = vpack.c.bf16 %v2839_v25, %v2839_v25  ;;  %v6059_v21 = vld [vmem:[%s8191_s9 + $0x628] ss:$28 sps:$4 sm:$0xff]   ;;  %v6064_v23 = vld [vmem:[%s8191_s9 + $0x65c] ss:$28 sps:$4 sm:$0xff]  }
 0x484   :  { %v6067_v24 = vld [vmem:[%s8191_s9 + $0x664] ss:$28 sps:$4 sm:$0xff]   ;;  %v6062_v25 = vld [vmem:[%s8191_s9 + $0x658] ss:$28 sps:$4 sm:$0xff]  }
 0x485   :  { %4321 = vmatprep.mubr.bf16.mxu1 %v7642_v26  ;;  %4403 = vmatprep.mubr.bf16.mxu0 %v7642_v26  ;;  %v6065_v1 = vld [vmem:[%s8191_s9 + $0x660] ss:$28 sps:$4 sm:$0xff]  }
 0x486   :  { %4322 = vmatmul.mubr.bf16.vlgmr.msra.gmra.mrb[12].mxu1 %v7650_v29  ;;  %4404 = vmatmul.mubr.bf16.vlgmr.msra.gmra.mrb[12].mxu0 %v7650_v29 }
 0x487   :  { %4331 = vmatpush1.bf16.msra.mxu1 %v5984_v27  ;;  %4413 = vmatpush1.bf16.msra.mxu0 %v5987_v28  ;;  %v2826_v27 = vadd.f32 %v7640_v6, %v2421_v22  ;;  %v6070_v28 = vld [vmem:[%s8191_s9 + $0x694] ss:$28 sps:$4 sm:$0xff]   ;;  %v6132_v22 = vld [vmem:[%s8191_s9 + $0x244] ss:$28 sps:$4 sm:$0xff]  }
 0x488   :  { %4362 = vmatprep.mubr.bf16.mxu1 %v7660_v32  ;;  %4444 = vmatprep.mubr.bf16.mxu0 %v7660_v32  ;;  %v6071_v6 = vld [vmem:[%s8191_s9 + $0x698] ss:$28 sps:$4 sm:$0xff]  }
 0x489   :  { %4332 = vmatprep.subr.bf16.mxu1 %v5992_v30  ;;  %4414 = vmatprep.subr.bf16.mxu0 %v5995_v31  ;;  %v6073_v30 = vld [vmem:[%s8191_s9 + $0x69c] ss:$28 sps:$4 sm:$0xff]   ;;  %v6068_v31 = vld [vmem:[%s8191_s9 + $0x690] ss:$28 sps:$4 sm:$0xff]  }
 0x48b   :  { %4333 = vmatpush1.bf16.msra.mxu1 %v5990_v33  ;;  %4415 = vmatpush1.bf16.msra.mxu0 %v5993_v34  ;;  %v2834_v33 = vmul.f32 0.01, %v2826_v27  ;;  %v6076_v34 = vld [vmem:[%s8191_s9 + $0x6cc] ss:$28 sps:$4 sm:$0xff]  }
 0x48c   :  { %4334 = vmatprep.subr.bf16.mxu1 %v5998_v35  ;;  %4416 = vmatprep.subr.bf16.mxu0 %v6001_v36  ;;  %v6079_v35 = vld [vmem:[%s8191_s9 + $0x6d4] ss:$28 sps:$4 sm:$0xff]   ;;  %v6074_v36 = vld [vmem:[%s8191_s9 + $0x6c8] ss:$28 sps:$4 sm:$0xff]  }
 0x48f   :  { %4335 = vmatpush1.bf16.msra.mxu1 %v5996_v37  ;;  %4417 = vmatpush1.bf16.msra.mxu0 %v5999_v38  ;;  %v6077_v37 = vld [vmem:[%s8191_s9 + $0x6d0] ss:$28 sps:$4 sm:$0xff]   ;;  %v2838_v38 = vmax.f32 %v2826_v27, %v2834_v33  ;;  %v6138_v27 = vld [vmem:[%s8191_s9 + $0x600] ss:$28 sps:$4 sm:$0xff]  }
 0x490   :  { %4336 = vmatprep.subr.bf16.mxu1 %v6004_v39  ;;  %4418 = vmatprep.subr.bf16.mxu0 %v6007_v40  ;;  %v6082_v39 = vld [vmem:[%s8191_s9 + $0x14] ss:$28 sps:$4 sm:$0xff]  }
 0x491   :  { %v6083_v40 = vld [vmem:[%s8191_s9 + $0x1d8] ss:$28 sps:$4 sm:$0xff]   ;;  %v6140_v33 = vld [vmem:[%s8191_s9 + $0x2b0] ss:$28 sps:$4 sm:$0xff]  }
 0x493   :  { %4337 = vmatpush1.bf16.msra.mxu1 %v6002_v41  ;;  %4419 = vmatpush1.bf16.msra.mxu0 %v6005_v42  ;;  %v6080_v41 = vld [vmem:[%s8191_s9 + $0x10] ss:$28 sps:$4 sm:$0xff]   ;;  %v7852_v42 = vpack.c.bf16 %v2838_v38, %v2838_v38 }
 0x494   :  { %4338 = vmatprep.subr.bf16.mxu1 %v6010_v43  ;;  %4420 = vmatprep.subr.bf16.mxu0 %v6013_v44  ;;  %v6084_v43 = vld [vmem:[%s8191_s9 + $0x18] ss:$28 sps:$4 sm:$0xff]   ;;  %v6087_v44 = vld [vmem:[%s8191_s9 + $0x4c] ss:$28 sps:$4 sm:$0xff]  }
 0x495   :  { %v6149_v38 = vld [vmem:[%s8191_s9 + $0x4b0] ss:$28 sps:$4 sm:$0xff]  }
 0x497   :  { %4339 = vmatpush1.bf16.msra.mxu1 %v6008_v45  ;;  %4421 = vmatpush1.bf16.msra.mxu0 %v6011_v46  ;;  %v6088_v45 = vld [vmem:[%s8191_s9 + $0x210] ss:$28 sps:$4 sm:$0xff]   ;;  %v6085_v46 = vld [vmem:[%s8191_s9 + $0x48] ss:$28 sps:$4 sm:$0xff]  }
 0x498   :  { %4340 = vmatprep.subr.bf16.mxu1 %v6016_v47  ;;  %4422 = vmatprep.subr.bf16.mxu0 %v6019_v48  ;;  %v6089_v47 = vld [vmem:[%s8191_s9 + $0x50] ss:$28 sps:$4 sm:$0xff]   ;;  %v6092_v48 = vld [vmem:[%s8191_s9 + $0x84] ss:$28 sps:$4 sm:$0xff]  }
 0x49b   :  { %4341 = vmatpush1.bf16.msra.mxu1 %v6014_v49  ;;  %4423 = vmatpush1.bf16.msra.mxu0 %v6017_v50  ;;  %v6093_v49 = vld [vmem:[%s8191_s9 + $0x248] ss:$28 sps:$4 sm:$0xff]   ;;  %v6090_v50 = vld [vmem:[%s8191_s9 + $0x80] ss:$28 sps:$4 sm:$0xff]  }
 0x49c   :  { %4342 = vmatprep.subr.bf16.mxu1 %v6022_v51  ;;  %4424 = vmatprep.subr.bf16.mxu0 %v6025_v52  ;;  %v6097_v51 = vld [vmem:[%s8191_s9 + $0xbc] ss:$28 sps:$4 sm:$0xff]  }
 0x49d   :  { %v6098_v52 = vld [vmem:[%s8191_s9 + $0x280] ss:$28 sps:$4 sm:$0xff]  }
 0x49f   :  { %4343 = vmatpush1.bf16.msra.mxu1 %v6020_v53  ;;  %4425 = vmatpush1.bf16.msra.mxu0 %v6023_v54  ;;  %v6095_v53 = vld [vmem:[%s8191_s9 + $0xb8] ss:$28 sps:$4 sm:$0xff]   ;;  %v6099_v54 = vld [vmem:[%s8191_s9 + $0xc0] ss:$28 sps:$4 sm:$0xff]  }
 0x4a0   :  { %4344 = vmatprep.subr.bf16.mxu1 %v6028_v55  ;;  %4426 = vmatprep.subr.bf16.mxu0 %v6031_v56  ;;  %v6102_v55 = vld [vmem:[%s8191_s9 + $0xf4] ss:$28 sps:$4 sm:$0xff]  }
 0x4a1   :  { %v6103_v56 = vld [vmem:[%s8191_s9 + $0x2b8] ss:$28 sps:$4 sm:$0xff]  }
 0x4a3   :  { %4345 = vmatpush1.bf16.msra.mxu1 %v6026_v57  ;;  %4427 = vmatpush1.bf16.msra.mxu0 %v6029_v58  ;;  %v6100_v57 = vld [vmem:[%s8191_s9 + $0xf0] ss:$28 sps:$4 sm:$0xff]   ;;  %v6104_v58 = vld [vmem:[%s8191_s9 + $0xf8] ss:$28 sps:$4 sm:$0xff]  }
 0x4a4   :  { %4346 = vmatprep.subr.bf16.mxu1 %v6034_v59  ;;  %4428 = vmatprep.subr.bf16.mxu0 %v6037_v60  ;;  %v6107_v59 = vld [vmem:[%s8191_s9 + $0x12c] ss:$28 sps:$4 sm:$0xff]  }
 0x4a5   :  { %v6108_v60 = vld [vmem:[%s8191_s9 + $0x2f0] ss:$28 sps:$4 sm:$0xff]  }
 0x4a7   :  { %4347 = vmatpush1.bf16.msra.mxu1 %v6032_v61  ;;  %4429 = vmatpush1.bf16.msra.mxu0 %v6035_v62  ;;  %v6105_v61 = vld [vmem:[%s8191_s9 + $0x128] ss:$28 sps:$4 sm:$0xff]   ;;  %v6109_v62 = vld [vmem:[%s8191_s9 + $0x130] ss:$28 sps:$4 sm:$0xff]  }
 0x4a8   :  { %4348 = vmatprep.subr.bf16.mxu1 %v6040_v63  ;;  %4430 = vmatprep.subr.bf16.mxu0 %v6043_v2  ;;  %v6112_v63 = vld [vmem:[%s8191_s9 + $0x164] ss:$28 sps:$4 sm:$0xff]  }
 0x4a9   :  { %v6113_v2 = vld [vmem:[%s8191_s9 + $0x328] ss:$28 sps:$4 sm:$0xff]  }
 0x4ab   :  { %4349 = vmatpush1.bf16.msra.mxu1 %v6038_v3  ;;  %4431 = vmatpush1.bf16.msra.mxu0 %v6041_v4  ;;  %v6110_v3 = vld [vmem:[%s8191_s9 + $0x160] ss:$28 sps:$4 sm:$0xff]   ;;  %v6114_v4 = vld [vmem:[%s8191_s9 + $0x168] ss:$28 sps:$4 sm:$0xff]  }
 0x4ac   :  { %4350 = vmatprep.subr.bf16.mxu1 %v6046_v5  ;;  %4432 = vmatprep.subr.bf16.mxu0 %v6049_v8  ;;  %v6117_v5 = vld [vmem:[%s8191_s9 + $0x19c] ss:$28 sps:$4 sm:$0xff]  }
 0x4ad   :  { %v6118_v8 = vld [vmem:[%s8191_s9 + $0x360] ss:$28 sps:$4 sm:$0xff]  }
 0x4af   :  { %4351 = vmatpush1.bf16.msra.mxu1 %v6044_v9  ;;  %4433 = vmatpush1.bf16.msra.mxu0 %v6047_v11  ;;  %v6115_v9 = vld [vmem:[%s8191_s9 + $0x198] ss:$28 sps:$4 sm:$0xff]   ;;  %v6119_v11 = vld [vmem:[%s8191_s9 + $0x1a0] ss:$28 sps:$4 sm:$0xff]  }
 0x4b0   :  { %4352 = vmatprep.subr.bf16.mxu1 %v6052_v13  ;;  %4434 = vmatprep.subr.bf16.mxu0 %v6055_v15  ;;  %v6122_v13 = vld [vmem:[%s8191_s9 + $0x1d4] ss:$28 sps:$4 sm:$0xff]  }
 0x4b1   :  { %v6123_v15 = vld [vmem:[%s8191_s9 + $0x558] ss:$28 sps:$4 sm:$0xff]  }
 0x4b3   :  { %4353 = vmatpush1.bf16.msra.mxu1 %v6050_v16  ;;  %4435 = vmatpush1.bf16.msra.mxu0 %v6053_v17  ;;  %v6120_v16 = vld [vmem:[%s8191_s9 + $0x1d0] ss:$28 sps:$4 sm:$0xff]   ;;  %v6124_v17 = vld [vmem:[%s8191_s9 + $0x398] ss:$28 sps:$4 sm:$0xff]  }
 0x4b4   :  { %4354 = vmatprep.subr.bf16.mxu1 %v6058_v18  ;;  %4436 = vmatprep.subr.bf16.mxu0 %v6061_v19  ;;  %v6127_v18 = vld [vmem:[%s8191_s9 + $0x20c] ss:$28 sps:$4 sm:$0xff]  }
 0x4b5   :  { %v6128_v19 = vld [vmem:[%s8191_s9 + $0x590] ss:$28 sps:$4 sm:$0xff]  }
 0x4b7   :  { %4355 = vmatpush1.bf16.msra.mxu1 %v6056_v20  ;;  %4437 = vmatpush1.bf16.msra.mxu0 %v6059_v21  ;;  %v6125_v20 = vld [vmem:[%s8191_s9 + $0x208] ss:$28 sps:$4 sm:$0xff]   ;;  %v6129_v21 = vld [vmem:[%s8191_s9 + $0x3d0] ss:$28 sps:$4 sm:$0xff]  }
 0x4b8   :  { %4356 = vmatprep.subr.bf16.mxu1 %v6064_v23  ;;  %4438 = vmatprep.subr.bf16.mxu0 %v6067_v24  ;;  %v6133_v23 = vld [vmem:[%s8191_s9 + $0x5c8] ss:$28 sps:$4 sm:$0xff]   ;;  %v6130_v24 = vld [vmem:[%s8191_s9 + $0x240] ss:$28 sps:$4 sm:$0xff]  }
 0x4bb   :  { %4357 = vmatpush1.bf16.msra.mxu1 %v6062_v25  ;;  %4439 = vmatpush1.bf16.msra.mxu0 %v6065_v1  ;;  %v6134_v25 = vld [vmem:[%s8191_s9 + $0x408] ss:$28 sps:$4 sm:$0xff]   ;;  %v6137_v1 = vld [vmem:[%s8191_s9 + $0x27c] ss:$28 sps:$4 sm:$0xff]  }
 0x4bc   :  { %4358 = vmatprep.subr.bf16.mxu1 %v6070_v28  ;;  %4440 = vmatprep.subr.bf16.mxu0 %v6073_v30  ;;  %v6135_v28 = vld [vmem:[%s8191_s9 + $0x278] ss:$28 sps:$4 sm:$0xff]   ;;  %v6139_v30 = vld [vmem:[%s8191_s9 + $0x440] ss:$28 sps:$4 sm:$0xff]  }
 0x4bf   :  { %4359 = vmatpush1.bf16.msra.mxu1 %v6068_v31  ;;  %4441 = vmatpush1.bf16.msra.mxu0 %v6071_v6  ;;  %v6142_v31 = vld [vmem:[%s8191_s9 + $0x2b4] ss:$28 sps:$4 sm:$0xff]  }
 0x4c0   :  { %4360 = vmatprep.subr.bf16.mxu1 %v6076_v34  ;;  %4442 = vmatprep.subr.bf16.mxu0 %v6079_v35  ;;  %v6143_v6 = vld [vmem:[%s8191_s9 + $0x638] ss:$28 sps:$4 sm:$0xff]   ;;  %v6147_v35 = vld [vmem:[%s8191_s9 + $0x2ec] ss:$28 sps:$4 sm:$0xff]  }
 0x4c1   :  { %v6144_v34 = vld [vmem:[%s8191_s9 + $0x478] ss:$28 sps:$4 sm:$0xff]  }
 0x4c3   :  { %4361 = vmatpush1.bf16.msra.mxu1 %v6074_v36  ;;  %4443 = vmatpush1.bf16.msra.mxu0 %v6077_v37  ;;  %v6148_v36 = vld [vmem:[%s8191_s9 + $0x670] ss:$28 sps:$4 sm:$0xff]   ;;  %v6145_v37 = vld [vmem:[%s8191_s9 + $0x2e8] ss:$28 sps:$4 sm:$0xff]  }
 0x4c4   :  { %4453 = vmatprep.subr.bf16.mxu1 %v6082_v39  ;;  %5250 = vmatprep.subr.bf16.mxu0 %v6083_v40  ;;  %v6152_v39 = vld [vmem:[%s8191_s9 + $0x324] ss:$28 sps:$4 sm:$0xff]  }
 0x4c5   :  { %v6153_v40 = vld [vmem:[%s8191_s9 + $0x6a8] ss:$28 sps:$4 sm:$0xff]  }
 0x4c6   :  { %4363 = vmatmul.mubr.bf16.vlgmr.msra.gmra.mrb[12].mxu1 %v7852_v42  ;;  %4445 = vmatmul.mubr.bf16.vlgmr.msra.gmra.mrb[12].mxu0 %v7852_v42 }
 0x4c7   :  { %4454 = vmatpush1.bf16.msra.mxu1 %v6080_v41  ;;  %4485 = vmatprep.mubr.bf16.mxu1 %v7642_v26  ;;  %v6150_v41 = vld [vmem:[%s8191_s9 + $0x320] ss:$28 sps:$4 sm:$0xff]  }
 0x4c8   :  { %5251 = vmatpush3.bf16.msra.mxu0 %v6084_v43  ;;  %4567 = vmatprep.mubr.bf16.mxu0 %v7642_v26  ;;  %v6094_v26 = vld [vmem:[%s8191_s9 + $0x88] ss:$28 sps:$4 sm:$0xff]  }
 0x4c9   :  { %4455 = vmatprep.subr.bf16.mxu1 %v6087_v44  ;;  %5252 = vmatprep.subr.bf16.mxu0 %v6088_v45  ;;  %v6154_v43 = vld [vmem:[%s8191_s9 + $0x4e8] ss:$28 sps:$4 sm:$0xff]   ;;  %v6157_v44 = vld [vmem:[%s8191_s9 + $0x35c] ss:$28 sps:$4 sm:$0xff]  }
 0x4ca   :  { %v6158_v45 = vld [vmem:[%s8191_s9 + $0x6e0] ss:$28 sps:$4 sm:$0xff]  }
 0x4cb   :  { %4456 = vmatpush1.bf16.msra.mxu1 %v6085_v46  ;;  %v6155_v46 = vld [vmem:[%s8191_s9 + $0x358] ss:$28 sps:$4 sm:$0xff]  }
 0x4cc   :  { %5253 = vmatpush3.bf16.msra.mxu0 %v6089_v47  ;;  %4457 = vmatprep.subr.bf16.mxu1 %v6092_v48  ;;  %v6159_v47 = vld [vmem:[%s8191_s9 + $0x520] ss:$28 sps:$4 sm:$0xff]   ;;  %v6162_v48 = vld [vmem:[%s8191_s9 + $0x394] ss:$28 sps:$4 sm:$0xff]  }
 0x4cd   :  { %5254 = vmatprep.subr.bf16.mxu0 %v6093_v49  ;;  %v6160_v49 = vld [vmem:[%s8191_s9 + $0x390] ss:$28 sps:$4 sm:$0xff]  }
 0x4cf   :  { %4458 = vmatpush1.bf16.msra.mxu1 %v6090_v50  ;;  %v6165_v50 = vld [vmem:[%s8191_s9 + $0x3cc] ss:$28 sps:$4 sm:$0xff]  }
 0x4d0   :  { %5255 = vmatpush3.bf16.msra.mxu0 %v6094_v26  ;;  %4459 = vmatprep.subr.bf16.mxu1 %v6097_v51  ;;  %v6163_v26 = vld [vmem:[%s8191_s9 + $0x3c8] ss:$28 sps:$4 sm:$0xff]  }
 0x4d1   :  { %5256 = vmatprep.subr.bf16.mxu0 %v6098_v52  ;;  %v6168_v51 = vld [vmem:[%s8191_s9 + $0x404] ss:$28 sps:$4 sm:$0xff]  }
 0x4d2   :  { %v6166_v52 = vld [vmem:[%s8191_s9 + $0x400] ss:$28 sps:$4 sm:$0xff]  }
 0x4d3   :  { %4460 = vmatpush1.bf16.msra.mxu1 %v6095_v53  ;;  %v6174_v53 = vld [vmem:[%s8191_s9 + $0x474] ss:$28 sps:$4 sm:$0xff]  }
 0x4d4   :  { %5257 = vmatpush3.bf16.msra.mxu0 %v6099_v54  ;;  %4461 = vmatprep.subr.bf16.mxu1 %v6102_v55  ;;  %v6172_v54 = vld [vmem:[%s8191_s9 + $0x470] ss:$28 sps:$4 sm:$0xff]  }
 0x4d5   :  { %5258 = vmatprep.subr.bf16.mxu0 %v6103_v56  ;;  %v6177_v55 = vld [vmem:[%s8191_s9 + $0x4ac] ss:$28 sps:$4 sm:$0xff]  }
 0x4d6   :  { %v6175_v56 = vld [vmem:[%s8191_s9 + $0x4a8] ss:$28 sps:$4 sm:$0xff]  }
 0x4d7   :  { %4462 = vmatpush1.bf16.msra.mxu1 %v6100_v57  ;;  %v6180_v57 = vld [vmem:[%s8191_s9 + $0x4e4] ss:$28 sps:$4 sm:$0xff]  }
 0x4d8   :  { %5259 = vmatpush3.bf16.msra.mxu0 %v6104_v58  ;;  %4463 = vmatprep.subr.bf16.mxu1 %v6107_v59  ;;  %v6178_v58 = vld [vmem:[%s8191_s9 + $0x4e0] ss:$28 sps:$4 sm:$0xff]  }
 0x4d9   :  { %5260 = vmatprep.subr.bf16.mxu0 %v6108_v60  ;;  %v6183_v59 = vld [vmem:[%s8191_s9 + $0x51c] ss:$28 sps:$4 sm:$0xff]  }
 0x4da   :  { %v6181_v60 = vld [vmem:[%s8191_s9 + $0x518] ss:$28 sps:$4 sm:$0xff]  }
 0x4db   :  { %4464 = vmatpush1.bf16.msra.mxu1 %v6105_v61  ;;  %v6186_v61 = vld [vmem:[%s8191_s9 + $0x554] ss:$28 sps:$4 sm:$0xff]  }
 0x4dc   :  { %5261 = vmatpush3.bf16.msra.mxu0 %v6109_v62  ;;  %4465 = vmatprep.subr.bf16.mxu1 %v6112_v63  ;;  %v6184_v62 = vld [vmem:[%s8191_s9 + $0x550] ss:$28 sps:$4 sm:$0xff]  }
 0x4dd   :  { %5262 = vmatprep.subr.bf16.mxu0 %v6113_v2  ;;  %v6189_v63 = vld [vmem:[%s8191_s9 + $0x58c] ss:$28 sps:$4 sm:$0xff]  }
 0x4de   :  { %v6187_v2 = vld [vmem:[%s8191_s9 + $0x588] ss:$28 sps:$4 sm:$0xff]  }
 0x4df   :  { %4466 = vmatpush1.bf16.msra.mxu1 %v6110_v3  ;;  %v6192_v3 = vld [vmem:[%s8191_s9 + $0x5c4] ss:$28 sps:$4 sm:$0xff]  }
 0x4e0   :  { %5263 = vmatpush3.bf16.msra.mxu0 %v6114_v4  ;;  %4467 = vmatprep.subr.bf16.mxu1 %v6117_v5  ;;  %v6190_v4 = vld [vmem:[%s8191_s9 + $0x5c0] ss:$28 sps:$4 sm:$0xff]  }
 0x4e1   :  { %5264 = vmatprep.subr.bf16.mxu0 %v6118_v8  ;;  %v6195_v5 = vld [vmem:[%s8191_s9 + $0x5fc] ss:$28 sps:$4 sm:$0xff]  }
 0x4e2   :  { %v6193_v8 = vld [vmem:[%s8191_s9 + $0x5f8] ss:$28 sps:$4 sm:$0xff]  }
 0x4e3   :  { %4468 = vmatpush1.bf16.msra.mxu1 %v6115_v9  ;;  %v6198_v9 = vld [vmem:[%s8191_s9 + $0x634] ss:$28 sps:$4 sm:$0xff]  }
 0x4e4   :  { %5265 = vmatpush3.bf16.msra.mxu0 %v6119_v11  ;;  %4469 = vmatprep.subr.bf16.mxu1 %v6122_v13  ;;  %v6196_v11 = vld [vmem:[%s8191_s9 + $0x630] ss:$28 sps:$4 sm:$0xff]  }
 0x4e5   :  { %5272 = vmatprep.subr.bf16.mxu0 %v6123_v15  ;;  %v6201_v13 = vld [vmem:[%s8191_s9 + $0x66c] ss:$28 sps:$4 sm:$0xff]  }
 0x4e6   :  { %v6199_v15 = vld [vmem:[%s8191_s9 + $0x668] ss:$28 sps:$4 sm:$0xff]  }
 0x4e7   :  { %4568 = vmatmul.mubr.bf16.vlgmr.msra.gmra.mrb[16].mxu0 %v7650_v29  ;;  %4470 = vmatpush1.bf16.msra.mxu1 %v6120_v16  ;;  %v6204_v16 = vld [vmem:[%s8191_s9 + $0x6a4] ss:$28 sps:$4 sm:$0xff]  }
 0x4e8   :  { %5273 = vmatpush3.bf16.msra.mxu0 %v6124_v17  ;;  %4607 = vmatprep.mubr.bf16.mxu0 %v7660_v32  ;;  %v6202_v17 = vld [vmem:[%s8191_s9 + $0x6a0] ss:$28 sps:$4 sm:$0xff]  }
 0x4e9   :  { %4471 = vmatprep.subr.bf16.mxu1 %v6127_v18  ;;  %5274 = vmatprep.subr.bf16.mxu0 %v6128_v19  ;;  %v6207_v18 = vld [vmem:[%s8191_s9 + $0x6dc] ss:$28 sps:$4 sm:$0xff]  }
 0x4ea   :  { %v6205_v19 = vld [vmem:[%s8191_s9 + $0x6d8] ss:$28 sps:$4 sm:$0xff]  }
 0x4eb   :  { %4472 = vmatpush1.bf16.msra.mxu1 %v6125_v20  ;;  %v8146_v20 = vld [vmem:[%s8194_s10] sm:$0x7f] }
 0x4ec   :  { %5275 = vmatpush3.bf16.msra.mxu0 %v6129_v21  ;;  %4473 = vmatprep.subr.bf16.mxu1 %v6132_v22  ;;  %v3105_v21 = vrot.slane %v8146_v20, %v7085_v10  ;;  %v3113_v22 = vrot.slane %v8146_v20, %v7188_v0 }
 0x4ed   :  { %5276 = vmatprep.subr.bf16.mxu0 %v6133_v23  ;;  %v3109_v23 = vrot.slane %v8146_v20, %v7096_v14 }
 0x4ef   :  { %4474 = vmatpush1.bf16.msra.mxu1 %v6130_v24  ;;  %v3117_v24 = vrot.slane %v8146_v20, %v7099_v12 }
 0x4f0   :  { %5277 = vmatpush3.bf16.msra.mxu0 %v6134_v25  ;;  %4475 = vmatprep.subr.bf16.mxu1 %v6137_v1 }
 0x4f1   :  { %5278 = vmatprep.subr.bf16.mxu0 %v6138_v27 }
 0x4f3   :  { %4476 = vmatpush1.bf16.msra.mxu1 %v6135_v28 }
 0x4f4   :  { %5279 = vmatpush3.bf16.msra.mxu0 %v6139_v30  ;;  %4477 = vmatprep.subr.bf16.mxu1 %v6142_v31 }
 0x4f5   :  { %5280 = vmatprep.subr.bf16.mxu0 %v6143_v6 }
 0x4f7   :  { %4478 = vmatpush1.bf16.msra.mxu1 %v6140_v33 }
 0x4f8   :  { %5281 = vmatpush3.bf16.msra.mxu0 %v6144_v34  ;;  %4479 = vmatprep.subr.bf16.mxu1 %v6147_v35 }
 0x4f9   :  { %5282 = vmatprep.subr.bf16.mxu0 %v6148_v36 }
 0x4fb   :  { %4480 = vmatpush1.bf16.msra.mxu1 %v6145_v37 }
 0x4fc   :  { %5283 = vmatpush3.bf16.msra.mxu0 %v6149_v38  ;;  %4481 = vmatprep.subr.bf16.mxu1 %v6152_v39 }
 0x4fd   :  { %5284 = vmatprep.subr.bf16.mxu0 %v6153_v40 }
 0x4ff   :  { %4482 = vmatpush1.bf16.msra.mxu1 %v6150_v41 }
 0x500   :  { %5285 = vmatpush3.bf16.msra.mxu0 %v6154_v43  ;;  %4483 = vmatprep.subr.bf16.mxu1 %v6157_v44 }
 0x501   :  { %5286 = vmatprep.subr.bf16.mxu0 %v6158_v45 }
 0x503   :  { %4484 = vmatpush1.bf16.msra.mxu1 %v6155_v46 }
 0x504   :  { %5287 = vmatpush3.bf16.msra.mxu0 %v6159_v47  ;;  %4494 = vmatprep.subr.bf16.mxu1 %v6162_v48 }
 0x506   :  { %4486 = vmatmul.mubr.bf16.vlgmr.msra.gmra.mrb[16].mxu1 %v7650_v29  ;;  %v6171_v29 = vld [vmem:[%s8191_s9 + $0x43c] ss:$28 sps:$4 sm:$0xff]  }
 0x507   :  { %4608 = vmatmul.mubr.bf16.vlgmr.msra.gmra.mrb[20].mxu0 %v7852_v42  ;;  %4495 = vmatpush1.bf16.msra.mxu1 %v6160_v49 }
 0x508   :  { %4526 = vmatprep.mubr.bf16.mxu1 %v7660_v32  ;;  %4496 = vmatprep.subr.bf16.mxu1 %v6165_v50  ;;  %v6169_v32 = vld [vmem:[%s8191_s9 + $0x438] ss:$28 sps:$4 sm:$0xff]  }
 0x50b   :  { %4497 = vmatpush1.bf16.msra.mxu1 %v6163_v26 }
 0x50c   :  { %4498 = vmatprep.subr.bf16.mxu1 %v6168_v51 }
 0x50f   :  { %4499 = vmatpush1.bf16.msra.mxu1 %v6166_v52 }
 0x510   :  { %4500 = vmatprep.subr.bf16.mxu1 %v6171_v29 }
 0x513   :  { %4501 = vmatpush1.bf16.msra.mxu1 %v6169_v32 }
 0x514   :  { %4502 = vmatprep.subr.bf16.mxu1 %v6174_v53 }
 0x517   :  { %4503 = vmatpush1.bf16.msra.mxu1 %v6172_v54 }
 0x518   :  { %4504 = vmatprep.subr.bf16.mxu1 %v6177_v55 }
 0x51b   :  { %4505 = vmatpush1.bf16.msra.mxu1 %v6175_v56  ;;  %v3128_v56 = vsub.s32 6, %v7076_v7 }
 0x51c   :  { %4506 = vmatprep.subr.bf16.mxu1 %v6180_v57 }
 0x51d   :  { %v3129_v57 = vrot.slane %v8146_v20, %v3128_v56 }
 0x51f   :  { %4507 = vmatpush1.bf16.msra.mxu1 %v6178_v58 }
 0x520   :  { %4508 = vmatprep.subr.bf16.mxu1 %v6183_v59 }
 0x523   :  { %4509 = vmatpush1.bf16.msra.mxu1 %v6181_v60 }
 0x524   :  { %4510 = vmatprep.subr.bf16.mxu1 %v6186_v61 }
 0x527   :  { %4511 = vmatpush1.bf16.msra.mxu1 %v6184_v62 }
 0x528   :  { %4512 = vmatprep.subr.bf16.mxu1 %v6189_v63 }
 0x52b   :  { %4513 = vmatpush1.bf16.msra.mxu1 %v6187_v2 }
 0x52c   :  { %4514 = vmatprep.subr.bf16.mxu1 %v6192_v3 }
 0x52f   :  { %4515 = vmatpush1.bf16.msra.mxu1 %v6190_v4 }
 0x530   :  { %4516 = vmatprep.subr.bf16.mxu1 %v6195_v5 }
 0x533   :  { %4517 = vmatpush1.bf16.msra.mxu1 %v6193_v8 }
 0x534   :  { %4518 = vmatprep.subr.bf16.mxu1 %v6198_v9 }
 0x537   :  { %4519 = vmatpush1.bf16.msra.mxu1 %v6196_v11  ;;  %v3120_v11 = vsub.s32 4, %v7076_v7 }
 0x538   :  { %4520 = vmatprep.subr.bf16.mxu1 %v6201_v13  ;;  %v3124_v13 = vsub.s32 5, %v7076_v7 }
 0x53b   :  { %4521 = vmatpush1.bf16.msra.mxu1 %v6199_v15  ;;  %v3121_v15 = vrot.slane %v8146_v20, %v3120_v11 }
 0x53c   :  { %4522 = vmatprep.subr.bf16.mxu1 %v6204_v16  ;;  %v3125_v16 = vrot.slane %v8146_v20, %v3124_v13 }
 0x53f   :  { %4523 = vmatpush1.bf16.msra.mxu1 %v6202_v17 }
 0x540   :  { %4524 = vmatprep.subr.bf16.mxu1 %v6207_v18 }
 0x543   :  { %4525 = vmatpush1.bf16.msra.mxu1 %v6205_v19 }
 0x546   :  { %4527 = vmatmul.mubr.bf16.vlgmr.msra.gmra.mrb[16].mxu1 %v7852_v42 }
 0x599   :  { %v4364_v25 = vpop.f32.mrb[12].mxu1  ;;  %v4446_v1 = vpop.f32.mrb[12].mxu0 }
 0x59a   :  { %v5300_v42 = vadd.f32 %v4364_v25, %v3105_v21  ;;  %v5302_v27 = vadd.f32 %v4446_v1, %v3113_v22  ;;  %v4366_v28 = vpop.f32.mrb[13].mxu1  ;;  %v4448_v30 = vpop.f32.mrb[13].mxu0 }
 0x59b   :  { %v5301_v31 = vadd.f32 %v4366_v28, %v3109_v23  ;;  %v5303_v6 = vadd.f32 %v4448_v30, %v3117_v24  ;;  %v4368_v33 = vpop.f32.mrb[14].mxu1  ;;  %v4450_v34 = vpop.f32.mrb[14].mxu0 }
 0x59c   :  { %v4615_v10 = vsub.f32 0.0, %v5300_v42  ;;  %v4617_v35 = vsub.f32 0.0, %v5302_v27  ;;  %v4369_v36 = vpop.f32.mrb[15].mxu1  ;;  %v4451_v0 = vpop.f32.mrb[15].mxu0 }
 0x59d   :  { %v4616_v37 = vsub.f32 0.0, %v5301_v31  ;;  %v4618_v38 = vsub.f32 0.0, %v5303_v6 }
 0x59e   :  { %v4622_v14 = vmul.f32 1.442695, %v4615_v10  ;;  %v4626_v39 = vmul.f32 1.442695, %v4617_v35 }
 0x59f   :  { %v4624_v40 = vmul.f32 1.442695, %v4616_v37  ;;  %v4628_v12 = vmul.f32 1.442695, %v4618_v38 }
 0x5a0   :  { %6208 = vpow2.f32 %v4622_v14 }
 0x5a1   :  { %6210 = vpow2.f32 %v4626_v39 }
 0x5a2   :  { %6212 = vpow2.f32 %v4624_v40 }
 0x5a3   :  { %6214 = vpow2.f32 %v4628_v12 }
 0x5aa   :  { %v6209_v41 = vpop.eup %6208 }
 0x5ab   :  { %v6211_v43 = vpop.eup %6210  ;;  %v4636_v44 = vadd.f32 1.0, %v6209_v41 }
 0x5ac   :  { %v6213_v45 = vpop.eup %6212  ;;  %v4638_v46 = vadd.f32 1.0, %v6211_v43 }
 0x5ad   :  { %v6215_v47 = vpop.eup %6214  ;;  %6216 = vrcp.f32 %v4636_v44  ;;  %v4637_v48 = vadd.f32 1.0, %v6213_v45 }
 0x5ae   :  { %6218 = vrcp.f32 %v4638_v46  ;;  %v4639_v49 = vadd.f32 1.0, %v6215_v47 }
 0x5af   :  { %6220 = vrcp.f32 %v4637_v48 }
 0x5b0   :  { %6222 = vrcp.f32 %v4639_v49 }
 0x5b7   :  { %v6217_v50 = vpop.eup %6216 }
 0x5b8   :  { %v6219_v26 = vpop.eup %6218  ;;  %4650 = vst [vmem:[%s8195_s11] sm:$0xff] %v6217_v50 }
 0x5b9   :  { %v6221_v51 = vpop.eup %6220  ;;  %4652 = vst [vmem:[%s8195_s11 + $0x10] sm:$0xff] %v6219_v26 }
 0x5ba   :  { %v6223_v52 = vpop.eup %6222  ;;  %4651 = vst [vmem:[%s8195_s11 + $0x8] sm:$0xff] %v6221_v51  ;;  %v5266_v29 = vpop.f32.mrb[16].mxu0 }
 0x5bb   :  { %4653 = vst [vmem:[%s8195_s11 + $0x18] sm:$0xff] %v6223_v52  ;;  %v5267_v32 = vpop.f32.mrb[17].mxu0 }
 0x5bc   :  { %v5268_v53 = vadd.f32 %v5267_v32, %v5266_v29  ;;  %v5269_v54 = vpop.f32.mrb[18].mxu0 }
 0x5bd   :  { %v5270_v55 = vpop.f32.mrb[19].mxu0 }
 0x5be   :  { %v4570_v60 = vadd.f32 %v5268_v53, %v3129_v57 }
 0x5da   :  { %v5288_v58 = vpop.f32.mrb[20].mxu0 }
 0x5db   :  { %v5289_v59 = vpop.f32.mrb[21].mxu0 }
 0x5dc   :  { %v5290_v61 = vadd.f32 %v5289_v59, %v5288_v58  ;;  %v5291_v62 = vpop.f32.mrb[22].mxu0 }
 0x5dd   :  { %v5292_v63 = vpop.f32.mrb[23].mxu0 }
 0x5de   :  { %v4610_v2 = vadd.f32 %v5290_v61, %v4570_v60 }
 0x5e0   :  { %v4621_v3 = vsub.f32 0.0, %v4610_v2 }
 0x5e2   :  { %v4634_v4 = vmul.f32 1.442695, %v4621_v3 }
 0x5e4   :  { %6224 = vpow2.f32 %v4634_v4 }
 0x5ee   :  { %v6225_v5 = vpop.eup %6224 }
 0x5ef   :  { %v4642_v8 = vadd.f32 1.0, %v6225_v5 }
 0x5f1   :  { %6226 = vrcp.f32 %v4642_v8 }
 0x5fb   :  { %v6227_v9 = vpop.eup %6226 }
 0x5fc   :  { %4656 = vst.msk [vmem:[%s8195_s11 + $0x30] sm:$0xff] %vm1265_vm0, %v6227_v9 }
 0x619   :  { %v4528_v17 = vpop.f32.mrb[16].mxu1 }
 0x61a   :  { %v5304_v18 = vadd.f32 %v4528_v17, %v3121_v15  ;;  %v4530_v19 = vpop.f32.mrb[17].mxu1 }
 0x61b   :  { %v5305_v21 = vadd.f32 %v4530_v19, %v3125_v16  ;;  %v4532_v22 = vpop.f32.mrb[18].mxu1 }
 0x61c   :  { %v4619_v23 = vsub.f32 0.0, %v5304_v18  ;;  %v4533_v24 = vpop.f32.mrb[19].mxu1 }
 0x61d   :  { %v4620_v25 = vsub.f32 0.0, %v5305_v21 }
 0x61e   :  { %v4630_v1 = vmul.f32 1.442695, %v4619_v23 }
 0x61f   :  { %v4632_v42 = vmul.f32 1.442695, %v4620_v25 }
 0x620   :  { %6228 = vpow2.f32 %v4630_v1 }
 0x621   :  { %6230 = vpow2.f32 %v4632_v42 }
 0x62a   :  { %v6229_v27 = vpop.eup %6228 }
 0x62b   :  { %v6231_v28 = vpop.eup %6230  ;;  %v4640_v30 = vadd.f32 1.0, %v6229_v27 }
 0x62c   :  { %v4641_v7 = vadd.f32 1.0, %v6231_v28 }
 0x62d   :  { %6232 = vrcp.f32 %v4640_v30 }
 0x62e   :  { %6234 = vrcp.f32 %v4641_v7 }
 0x637   :  { %v6233_v31 = vpop.eup %6232 }
 0x638   :  { %v6235_v20 = vpop.eup %6234  ;;  %4654 = vst [vmem:[%s8195_s11 + $0x20] sm:$0xff] %v6233_v31 }
 0x639   :  { %4655 = vst [vmem:[%s8195_s11 + $0x28] sm:$0xff] %v6235_v20 }

</bundles_post_ra>
